<compile_context>
chip_gen: v6e
topology: v6e:2x2x1
jax: 0.10.0
libtpu: 0.0.40
codegen_flags: <defaults>
</compile_context>

<pallas_src>
import functools
import math

import jax
import jax.numpy as jnp
from jax.experimental import pallas as pl
from jax.experimental.pallas import tpu as pltpu


def _pma_kernel(z_ref, seed_ref, wq_ref, wkv_ref, wo_ref, wr_ref, bkv_ref,
                vec_ref, out_ref, *, num_heads, head_dim, eps):
    """One grid step = one batch tile.  Computes the full MAB(seed, z) block:
       MHA(seed, z, z) -> residual + LayerNorm1 -> rFF -> residual + LayerNorm2."""
    h = num_heads
    p = head_dim
    tb, n, d = z_ref.shape
    rows = seed_ref.shape[0]         # tb * kq  (kq already padded to 8-multiple)
    kq = rows // tb
    f32 = jnp.float32

    seed_rep = seed_ref[...]         # (tb*kq, d): row b*kq + q  ->  seed[q]
    wq = wq_ref[...]                 # (d, d)
    wkv = wkv_ref[...]               # (d, 2d) = [Wk | Wv]
    wo = wo_ref[...]                 # (d, d)   concat/output projection
    wr = wr_ref[...]                 # (d, d)   rFF weight
    bkv = bkv_ref[...]               # (1, 2d) = [bk | bv]
    vecs = vec_ref[...]              # (7, d): bq, bo, g1, b1, br, g2, b2
    bq = vecs[0:1]
    bo = vecs[1:2]
    g1 = vecs[2:3]
    b1 = vecs[3:4]
    br = vecs[4:5]
    g2 = vecs[5:6]
    b2 = vecs[6:7]

    inv_temp = 1.0 / (float(p) ** 0.5)

    # ---- Q projection: seeds are shared across the batch -> one small matmul.
    seed = seed_rep[0:kq]                                             # (kq, d)
    q = jnp.dot(seed, wq, preferred_element_type=f32) + bq            # (kq, d)

    # ---- fused K/V projection: one (tb*n, d) x (d, 2d) MXU matmul.
    z2 = z_ref[...].reshape(tb * n, d)
    kv = jnp.dot(z2, wkv, preferred_element_type=f32) + bkv           # (tb*n, 2d)

    # ---- per-head attention (h is small & static; leading-batch 3-D einsums)
    #      with the head-concat + output projection folded into per-head
    #      (tb*kq, p) @ (p, d) MXU passes accumulated in f32.
    attn = None
    for hi in range(h):
        q_i = jnp.broadcast_to(q[None, :, hi * p:(hi + 1) * p], (tb, kq, p))
        k_i = kv[:, hi * p:(hi + 1) * p].reshape(tb, n, p)
        v_i = kv[:, d + hi * p:d + (hi + 1) * p].reshape(tb, n, p)

        s = jnp.einsum('bqp,bnp->bqn', q_i, k_i,
                       preferred_element_type=f32) * inv_temp          # (tb, kq, n)
        s = s - jnp.max(s, axis=-1, keepdims=True)
        e = jnp.exp(s)
        pr = e * pl.reciprocal(jnp.sum(e, axis=-1, keepdims=True), approx=False)
        o_i = jnp.einsum('bqn,bnp->bqp', pr, v_i,
                         preferred_element_type=f32)                   # (tb, kq, p)

        part = jnp.dot(o_i.reshape(tb * kq, p), wo[hi * p:(hi + 1) * p, :],
                       preferred_element_type=f32)                     # (tb*kq, d)
        attn = part if attn is None else attn + part
    attn = attn + bo

    # ---- residual + LayerNorm1 (merged 2-D rows) ----
    x1 = attn + seed_rep
    mu1 = jnp.mean(x1, axis=-1, keepdims=True)
    var1 = jnp.mean((x1 - mu1) ** 2, axis=-1, keepdims=True)
    h1 = (x1 - mu1) * jax.lax.rsqrt(var1 + eps) * g1 + b1

    # ---- rFF: one (tb*kq, d) x (d, d) matmul + ReLU ----
    r = jnp.maximum(jnp.dot(h1, wr, preferred_element_type=f32) + br, 0.0)

    # ---- residual + LayerNorm2 ----
    x2 = h1 + r
    mu2 = jnp.mean(x2, axis=-1, keepdims=True)
    var2 = jnp.mean((x2 - mu2) ** 2, axis=-1, keepdims=True)
    out = (x2 - mu2) * jax.lax.rsqrt(var2 + eps) * g2 + b2

    out_ref[...] = out.astype(out_ref.dtype)


def pooling_multihead_attention(z, params, *, num_heads, batch_tile=None):
    """z: (b, n, d) float32. Returns (b, k, d) float32."""
    b, n, d = z.shape
    seed = params["seed"]
    kq = seed.shape[0]
    assert d % num_heads == 0
    h = num_heads
    p = d // h

    # Pad the seed count up to the 8-sublane granule: keeps every in-kernel
    # reshape on whole 8-row blocks; padded rows are dropped again below.
    kq_p = -(-kq // 8) * 8
    if kq_p == kq:
        seed_p = seed
    else:
        seed_p = jnp.concatenate(
            [seed, jnp.zeros((kq_p - kq, d), seed.dtype)], axis=0)

    # Batch-tile heuristic: single grid step unless per-step work clearly
    # amortizes the ~0.35us pipeline overhead (then split in two so both v7x
    # TensorCores get a 'parallel' step; harmless on 1-TC v5e/v6e).
    if batch_tile is None:
        kv_flops = 2 * b * n * d * 2 * d          # dominant fused K/V matmul
        batch_tile = b // 2 if (b % 2 == 0 and kv_flops >= 2 * 10**8) else b
    tb = batch_tile
    assert b % tb == 0, "batch must be divisible by the batch tile"
    grid = b // tb

    # ---- wrapper-side parameter packing (layout plumbing, runs once in XLA) ----
    for name in ("bq", "bk", "bv", "bo", "g1", "b1", "br", "g2", "b2"):
        assert params[name].shape == (1, d), name
    w_kv = jnp.concatenate([params["wk"], params["wv"]], axis=1)      # (d, 2d)
    b_kv = jnp.concatenate([params["bk"], params["bv"]], axis=1)      # (1, 2d)
    vecs = jnp.concatenate([params["bq"], params["bo"], params["g1"],
                            params["b1"], params["br"], params["g2"],
                            params["b2"]], axis=0)                    # (7, d)
    seed_rep = jnp.tile(seed_p, (tb, 1))                              # (tb*kq_p, d)

    kernel = functools.partial(_pma_kernel, num_heads=h, head_dim=p, eps=1e-5)

    out2d = pl.pallas_call(
        kernel,
        out_shape=jax.ShapeDtypeStruct((b * kq_p, d), jnp.float32),
        grid_spec=pltpu.PrefetchScalarGridSpec(
            num_scalar_prefetch=0,
            grid=(grid,),
            in_specs=[
                pl.BlockSpec((tb, n, d), lambda i: (i, 0, 0)),         # z batch tile
                pl.BlockSpec((tb * kq_p, d), lambda i: (0, 0)),        # tiled seeds
                pl.BlockSpec((d, d), lambda i: (0, 0)),                # wq
                pl.BlockSpec((d, 2 * d), lambda i: (0, 0)),            # [wk | wv]
                pl.BlockSpec((d, d), lambda i: (0, 0)),                # wo
                pl.BlockSpec((d, d), lambda i: (0, 0)),                # wr (rFF)
                pl.BlockSpec((1, 2 * d), lambda i: (0, 0)),            # [bk | bv]
                pl.BlockSpec((7, d), lambda i: (0, 0)),                # bq,bo,ln1,br,ln2
            ],
            out_specs=pl.BlockSpec((tb * kq_p, d), lambda i: (i, 0)),
        ),
        compiler_params=pltpu.CompilerParams(
            dimension_semantics=("parallel",)),
    )(z, seed_rep, params["wq"], w_kv, params["wo"], params["wr"], b_kv, vecs)

    out = out2d.reshape(b, kq_p, d)
    return out if kq_p == kq else out[:, :kq, :]


def _reference(z, params, *, num_heads):
    """Pure-JAX reference mirroring the PyTorch module math."""
    b, n, d = z.shape
    seed = params["seed"]
    k_seeds = seed.shape[0]
    p = d // num_heads
    s = jnp.broadcast_to(seed[None], (b, k_seeds, d))

    q = s @ params["wq"] + params["bq"]
    k = z @ params["wk"] + params["bk"]
    v = z @ params["wv"] + params["bv"]

    def split_heads(x, length):
        x = x.reshape(b, length, num_heads, p)
        x = jnp.transpose(x, (2, 0, 1, 3)).reshape(num_heads * b, length, p)
        return x

    qh = split_heads(q, k_seeds)
    kh = split_heads(k, n)
    vh = split_heads(v, n)

    att = jnp.einsum("bij,bkj->bik", qh, kh) / (p ** 0.5)
    att = jax.nn.softmax(att, axis=2)
    oh = jnp.einsum("bik,bkj->bij", att, vh)
    oh = oh.reshape(num_heads, b, k_seeds, p)
    o = jnp.transpose(oh, (1, 2, 0, 3)).reshape(b, k_seeds, d)
    o = o @ params["wo"] + params["bo"]

    def layernorm(x, g, bta):
        mu = jnp.mean(x, axis=-1, keepdims=True)
        var = jnp.mean((x - mu) ** 2, axis=-1, keepdims=True)
        return (x - mu) * jax.lax.rsqrt(var + 1e-5) * g + bta

    h1 = layernorm(s + o, params["g1"], params["b1"])
    r = jnp.maximum(h1 @ params["wr"] + params["br"], 0.0)
    return layernorm(h1 + r, params["g2"], params["b2"])


def _init_params(key, d, k_seeds):
    """Xavier-normal Linear weights like the module; biases / LayerNorm affine
    params get small random values (module inits them to 0 / identity) purely
    to exercise every bias path in the correctness check.  Weights are stored
    as (in, out) so y = x @ W + b."""
    keys = jax.random.split(key, 15)
    std = math.sqrt(2.0 / (d + d))   # xavier normal for square Linear(d, d)

    def lin(k):
        return jax.random.normal(k, (d, d), jnp.float32) * std

    def row(k, s):
        return jax.random.normal(k, (1, d), jnp.float32) * s

    return {
        "seed": jax.random.normal(keys[0], (k_seeds, d), jnp.float32),
        "wq": lin(keys[1]), "bq": row(keys[2], 0.1),
        "wk": lin(keys[3]), "bk": row(keys[4], 0.1),
        "wv": lin(keys[5]), "bv": row(keys[6], 0.1),
        "wo": lin(keys[7]), "bo": row(keys[8], 0.1),
        "g1": 1.0 + row(keys[9], 0.05), "b1": row(keys[10], 0.05),
        "wr": lin(keys[11]), "br": row(keys[12], 0.1),
        "g2": 1.0 + row(keys[13], 0.05), "b2": row(keys[14], 0.05),
    }


if __name__ == "__main__":
    B, N, D = 8, 8, 32       # batch, input set size, feature dim
    K_SEEDS, HEADS = 4, 4    # number of pooled seed vectors, attention heads

    key = jax.random.PRNGKey(0)
    kp, kz = jax.random.split(key)
    params = _init_params(kp, D, K_SEEDS)
    z = jax.random.normal(kz, (B, N, D), jnp.float32)

    out = jax.block_until_ready(
        pooling_multihead_attention(z, params, num_heads=HEADS))

    ref = _reference(z, params, num_heads=HEADS)
    assert out.shape == (B, K_SEEDS, D)
    err = float(jnp.max(jnp.abs(out - ref)))
    assert jnp.allclose(out, ref, rtol=1e-5, atol=2e-5), f"max abs err {err}"

    print("KERNEL_OK")
</pallas_src>

<mosaic_0001>
module attributes {stable_mosaic.version = 11 : i64} {
  func.func @_pma_kernel(%arg0: i32, %arg1: memref<8x8x32xf32, #tpu.memory_space<vmem>>, %arg2: memref<64x32xf32, #tpu.memory_space<vmem>>, %arg3: memref<32x32xf32, #tpu.memory_space<vmem>>, %arg4: memref<32x64xf32, #tpu.memory_space<vmem>>, %arg5: memref<32x32xf32, #tpu.memory_space<vmem>>, %arg6: memref<32x32xf32, #tpu.memory_space<vmem>>, %arg7: memref<1x64xf32, #tpu.memory_space<vmem>>, %arg8: memref<7x32xf32, #tpu.memory_space<vmem>>, %arg9: memref<64x32xf32, #tpu.memory_space<vmem>>) attributes {dimension_semantics = [#tpu.dimension_semantics<parallel>], iteration_bounds = array<i64: 1>, scalar_prefetch = 0 : i64, scratch_operands = 0 : i64, tpu.core_type = #tpu.core_type<tc>, window_params = [{transform_indices = @transform_0, window_bounds = array<i64: 8, 8, 32>}, {pipeline_mode = #tpu.pipeline_mode<synchronous>, transform_indices = @transform_1, window_bounds = array<i64: 64, 32>}, {pipeline_mode = #tpu.pipeline_mode<synchronous>, transform_indices = @transform_2, window_bounds = array<i64: 32, 32>}, {pipeline_mode = #tpu.pipeline_mode<synchronous>, transform_indices = @transform_3, window_bounds = array<i64: 32, 64>}, {pipeline_mode = #tpu.pipeline_mode<synchronous>, transform_indices = @transform_4, window_bounds = array<i64: 32, 32>}, {pipeline_mode = #tpu.pipeline_mode<synchronous>, transform_indices = @transform_5, window_bounds = array<i64: 32, 32>}, {pipeline_mode = #tpu.pipeline_mode<synchronous>, transform_indices = @transform_6, window_bounds = array<i64: 1, 64>}, {pipeline_mode = #tpu.pipeline_mode<synchronous>, transform_indices = @transform_7, window_bounds = array<i64: 7, 32>}, {transform_indices = @transform_8, window_bounds = array<i64: 64, 32>}]} {
    %c0 = arith.constant 0 : index
    %c0_0 = arith.constant 0 : index
    %0 = vector.load %arg2[%c0, %c0_0] : memref<64x32xf32, #tpu.memory_space<vmem>>, vector<64x32xf32>
    %c0_1 = arith.constant 0 : index
    %c0_2 = arith.constant 0 : index
    %1 = vector.load %arg3[%c0_1, %c0_2] : memref<32x32xf32, #tpu.memory_space<vmem>>, vector<32x32xf32>
    %c0_3 = arith.constant 0 : index
    %c0_4 = arith.constant 0 : index
    %2 = vector.load %arg4[%c0_3, %c0_4] : memref<32x64xf32, #tpu.memory_space<vmem>>, vector<32x64xf32>
    %c0_5 = arith.constant 0 : index
    %c0_6 = arith.constant 0 : index
    %3 = vector.load %arg5[%c0_5, %c0_6] : memref<32x32xf32, #tpu.memory_space<vmem>>, vector<32x32xf32>
    %c0_7 = arith.constant 0 : index
    %c0_8 = arith.constant 0 : index
    %4 = vector.load %arg6[%c0_7, %c0_8] : memref<32x32xf32, #tpu.memory_space<vmem>>, vector<32x32xf32>
    %c0_9 = arith.constant 0 : index
    %c0_10 = arith.constant 0 : index
    %5 = vector.load %arg7[%c0_9, %c0_10] : memref<1x64xf32, #tpu.memory_space<vmem>>, vector<1x64xf32>
    %c0_11 = arith.constant 0 : index
    %c0_12 = arith.constant 0 : index
    %6 = vector.load %arg8[%c0_11, %c0_12] : memref<7x32xf32, #tpu.memory_space<vmem>>, vector<7x32xf32>
    %7 = vector.extract_strided_slice %6 {offsets = [0, 0], sizes = [1, 32], strides = [1, 1]} : vector<7x32xf32> to vector<1x32xf32>
    %8 = vector.extract_strided_slice %6 {offsets = [1, 0], sizes = [1, 32], strides = [1, 1]} : vector<7x32xf32> to vector<1x32xf32>
    %9 = vector.extract_strided_slice %6 {offsets = [2, 0], sizes = [1, 32], strides = [1, 1]} : vector<7x32xf32> to vector<1x32xf32>
    %10 = vector.extract_strided_slice %6 {offsets = [3, 0], sizes = [1, 32], strides = [1, 1]} : vector<7x32xf32> to vector<1x32xf32>
    %11 = vector.extract_strided_slice %6 {offsets = [4, 0], sizes = [1, 32], strides = [1, 1]} : vector<7x32xf32> to vector<1x32xf32>
    %12 = vector.extract_strided_slice %6 {offsets = [5, 0], sizes = [1, 32], strides = [1, 1]} : vector<7x32xf32> to vector<1x32xf32>
    %13 = vector.extract_strided_slice %6 {offsets = [6, 0], sizes = [1, 32], strides = [1, 1]} : vector<7x32xf32> to vector<1x32xf32>
    %14 = vector.extract_strided_slice %0 {offsets = [0, 0], sizes = [8, 32], strides = [1, 1]} : vector<64x32xf32> to vector<8x32xf32>
    %cst = arith.constant dense<0.000000e+00> : vector<8x32xf32>
    %15 = tpu.matmul %14, %1, %cst {dimension_numbers = #tpu.dot_dimension_numbers<[1], [0], [0], [1], [0, 0, 1, 1], [], []>} : vector<8x32xf32>, vector<32x32xf32>, vector<8x32xf32> -> vector<8x32xf32>
    %16 = vector.broadcast %7 : vector<1x32xf32> to vector<8x32xf32>
    %17 = arith.addf %15, %16 : vector<8x32xf32>
    %c0_13 = arith.constant 0 : index
    %c0_14 = arith.constant 0 : index
    %c0_15 = arith.constant 0 : index
    %18 = vector.load %arg1[%c0_13, %c0_14, %c0_15] : memref<8x8x32xf32, #tpu.memory_space<vmem>>, vector<8x8x32xf32>
    %19 = vector.shape_cast %18 : vector<8x8x32xf32> to vector<64x32xf32>
    %cst_16 = arith.constant dense<0.000000e+00> : vector<64x64xf32>
    %20 = tpu.matmul %19, %2, %cst_16 {dimension_numbers = #tpu.dot_dimension_numbers<[1], [0], [0], [1], [0, 0, 1, 1], [], []>} : vector<64x32xf32>, vector<32x64xf32>, vector<64x64xf32> -> vector<64x64xf32>
    %21 = vector.broadcast %5 : vector<1x64xf32> to vector<64x64xf32>
    %22 = arith.addf %20, %21 : vector<64x64xf32>
    %23 = vector.extract_strided_slice %17 {offsets = [0, 0], sizes = [8, 8], strides = [1, 1]} : vector<8x32xf32> to vector<8x8xf32>
    %24 = vector.shape_cast %23 : vector<8x8xf32> to vector<1x8x8xf32>
    %25 = vector.shape_cast %24 : vector<1x8x8xf32> to vector<1x8x8xf32>
    %26 = vector.broadcast %25 : vector<1x8x8xf32> to vector<8x8x8xf32>
    %27 = vector.extract_strided_slice %22 {offsets = [0, 0], sizes = [64, 8], strides = [1, 1]} : vector<64x64xf32> to vector<64x8xf32>
    %28 = vector.shape_cast %27 : vector<64x8xf32> to vector<8x8x8xf32>
    %29 = vector.extract_strided_slice %22 {offsets = [0, 32], sizes = [64, 8], strides = [1, 1]} : vector<64x64xf32> to vector<64x8xf32>
    %30 = vector.shape_cast %29 : vector<64x8xf32> to vector<8x8x8xf32>
    "tpu.trace_start"() <{level = 10 : i32, message = "bqp,bnp->bqn"}> : () -> ()
    %cst_17 = arith.constant dense<0.000000e+00> : vector<8x8x8xf32>
    %31 = tpu.matmul %26, %28, %cst_17 {dimension_numbers = #tpu.dot_dimension_numbers<[2], [2], [1], [1], [0, 0, 0, 1, 1, 1], [0], [0]>} : vector<8x8x8xf32>, vector<8x8x8xf32>, vector<8x8x8xf32> -> vector<8x8x8xf32>
    "tpu.trace_stop"() : () -> ()
    %cst_18 = arith.constant 0.353553385 : f32
    %32 = vector.broadcast %cst_18 : f32 to vector<8x8x8xf32>
    %33 = arith.mulf %31, %32 : vector<8x8x8xf32>
    %cst_19 = arith.constant dense<0xFF800000> : vector<8x8xf32>
    %34 = vector.multi_reduction <maximumf>, %33, %cst_19 [2] : vector<8x8x8xf32> to vector<8x8xf32>
    %35 = vector.shape_cast %34 : vector<8x8xf32> to vector<8x8x1xf32>
    %36 = vector.broadcast %35 : vector<8x8x1xf32> to vector<8x8x8xf32>
    %37 = arith.subf %33, %36 : vector<8x8x8xf32>
    %38 = math.exp %37 : vector<8x8x8xf32>
    %cst_20 = arith.constant dense<0.000000e+00> : vector<8x8xf32>
    %39 = vector.multi_reduction <add>, %38, %cst_20 [2] : vector<8x8x8xf32> to vector<8x8xf32>
    %40 = vector.shape_cast %39 : vector<8x8xf32> to vector<8x8x1xf32>
    %41 = tpu.reciprocal %40 : vector<8x8x1xf32> -> vector<8x8x1xf32>
    %42 = vector.broadcast %41 : vector<8x8x1xf32> to vector<8x8x8xf32>
    %43 = arith.mulf %38, %42 : vector<8x8x8xf32>
    "tpu.trace_start"() <{level = 10 : i32, message = "bqn,bnp->bqp"}> : () -> ()
    %cst_21 = arith.constant dense<0.000000e+00> : vector<8x8x8xf32>
    %44 = tpu.matmul %43, %30, %cst_21 {dimension_numbers = #tpu.dot_dimension_numbers<[2], [1], [1], [2], [0, 0, 0, 1, 1, 2], [0], [0]>} : vector<8x8x8xf32>, vector<8x8x8xf32>, vector<8x8x8xf32> -> vector<8x8x8xf32>
    "tpu.trace_stop"() : () -> ()
    %45 = vector.shape_cast %44 : vector<8x8x8xf32> to vector<64x8xf32>
    %46 = vector.extract_strided_slice %3 {offsets = [0, 0], sizes = [8, 32], strides = [1, 1]} : vector<32x32xf32> to vector<8x32xf32>
    %cst_22 = arith.constant dense<0.000000e+00> : vector<64x32xf32>
    %47 = tpu.matmul %45, %46, %cst_22 {dimension_numbers = #tpu.dot_dimension_numbers<[1], [0], [0], [1], [0, 0, 1, 1], [], []>} : vector<64x8xf32>, vector<8x32xf32>, vector<64x32xf32> -> vector<64x32xf32>
    %48 = vector.extract_strided_slice %17 {offsets = [0, 8], sizes = [8, 8], strides = [1, 1]} : vector<8x32xf32> to vector<8x8xf32>
    %49 = vector.shape_cast %48 : vector<8x8xf32> to vector<1x8x8xf32>
    %50 = vector.shape_cast %49 : vector<1x8x8xf32> to vector<1x8x8xf32>
    %51 = vector.broadcast %50 : vector<1x8x8xf32> to vector<8x8x8xf32>
    %52 = vector.extract_strided_slice %22 {offsets = [0, 8], sizes = [64, 8], strides = [1, 1]} : vector<64x64xf32> to vector<64x8xf32>
    %53 = vector.shape_cast %52 : vector<64x8xf32> to vector<8x8x8xf32>
    %54 = vector.extract_strided_slice %22 {offsets = [0, 40], sizes = [64, 8], strides = [1, 1]} : vector<64x64xf32> to vector<64x8xf32>
    %55 = vector.shape_cast %54 : vector<64x8xf32> to vector<8x8x8xf32>
    "tpu.trace_start"() <{level = 10 : i32, message = "bqp,bnp->bqn"}> : () -> ()
    %cst_23 = arith.constant dense<0.000000e+00> : vector<8x8x8xf32>
    %56 = tpu.matmul %51, %53, %cst_23 {dimension_numbers = #tpu.dot_dimension_numbers<[2], [2], [1], [1], [0, 0, 0, 1, 1, 1], [0], [0]>} : vector<8x8x8xf32>, vector<8x8x8xf32>, vector<8x8x8xf32> -> vector<8x8x8xf32>
    "tpu.trace_stop"() : () -> ()
    %cst_24 = arith.constant 0.353553385 : f32
    %57 = vector.broadcast %cst_24 : f32 to vector<8x8x8xf32>
    %58 = arith.mulf %56, %57 : vector<8x8x8xf32>
    %cst_25 = arith.constant dense<0xFF800000> : vector<8x8xf32>
    %59 = vector.multi_reduction <maximumf>, %58, %cst_25 [2] : vector<8x8x8xf32> to vector<8x8xf32>
    %60 = vector.shape_cast %59 : vector<8x8xf32> to vector<8x8x1xf32>
    %61 = vector.broadcast %60 : vector<8x8x1xf32> to vector<8x8x8xf32>
    %62 = arith.subf %58, %61 : vector<8x8x8xf32>
    %63 = math.exp %62 : vector<8x8x8xf32>
    %cst_26 = arith.constant dense<0.000000e+00> : vector<8x8xf32>
    %64 = vector.multi_reduction <add>, %63, %cst_26 [2] : vector<8x8x8xf32> to vector<8x8xf32>
    %65 = vector.shape_cast %64 : vector<8x8xf32> to vector<8x8x1xf32>
    %66 = tpu.reciprocal %65 : vector<8x8x1xf32> -> vector<8x8x1xf32>
    %67 = vector.broadcast %66 : vector<8x8x1xf32> to vector<8x8x8xf32>
    %68 = arith.mulf %63, %67 : vector<8x8x8xf32>
    "tpu.trace_start"() <{level = 10 : i32, message = "bqn,bnp->bqp"}> : () -> ()
    %cst_27 = arith.constant dense<0.000000e+00> : vector<8x8x8xf32>
    %69 = tpu.matmul %68, %55, %cst_27 {dimension_numbers = #tpu.dot_dimension_numbers<[2], [1], [1], [2], [0, 0, 0, 1, 1, 2], [0], [0]>} : vector<8x8x8xf32>, vector<8x8x8xf32>, vector<8x8x8xf32> -> vector<8x8x8xf32>
    "tpu.trace_stop"() : () -> ()
    %70 = vector.shape_cast %69 : vector<8x8x8xf32> to vector<64x8xf32>
    %71 = vector.extract_strided_slice %3 {offsets = [8, 0], sizes = [8, 32], strides = [1, 1]} : vector<32x32xf32> to vector<8x32xf32>
    %cst_28 = arith.constant dense<0.000000e+00> : vector<64x32xf32>
    %72 = tpu.matmul %70, %71, %cst_28 {dimension_numbers = #tpu.dot_dimension_numbers<[1], [0], [0], [1], [0, 0, 1, 1], [], []>} : vector<64x8xf32>, vector<8x32xf32>, vector<64x32xf32> -> vector<64x32xf32>
    %73 = arith.addf %47, %72 : vector<64x32xf32>
    %74 = vector.extract_strided_slice %17 {offsets = [0, 16], sizes = [8, 8], strides = [1, 1]} : vector<8x32xf32> to vector<8x8xf32>
    %75 = vector.shape_cast %74 : vector<8x8xf32> to vector<1x8x8xf32>
    %76 = vector.shape_cast %75 : vector<1x8x8xf32> to vector<1x8x8xf32>
    %77 = vector.broadcast %76 : vector<1x8x8xf32> to vector<8x8x8xf32>
    %78 = vector.extract_strided_slice %22 {offsets = [0, 16], sizes = [64, 8], strides = [1, 1]} : vector<64x64xf32> to vector<64x8xf32>
    %79 = vector.shape_cast %78 : vector<64x8xf32> to vector<8x8x8xf32>
    %80 = vector.extract_strided_slice %22 {offsets = [0, 48], sizes = [64, 8], strides = [1, 1]} : vector<64x64xf32> to vector<64x8xf32>
    %81 = vector.shape_cast %80 : vector<64x8xf32> to vector<8x8x8xf32>
    "tpu.trace_start"() <{level = 10 : i32, message = "bqp,bnp->bqn"}> : () -> ()
    %cst_29 = arith.constant dense<0.000000e+00> : vector<8x8x8xf32>
    %82 = tpu.matmul %77, %79, %cst_29 {dimension_numbers = #tpu.dot_dimension_numbers<[2], [2], [1], [1], [0, 0, 0, 1, 1, 1], [0], [0]>} : vector<8x8x8xf32>, vector<8x8x8xf32>, vector<8x8x8xf32> -> vector<8x8x8xf32>
    "tpu.trace_stop"() : () -> ()
    %cst_30 = arith.constant 0.353553385 : f32
    %83 = vector.broadcast %cst_30 : f32 to vector<8x8x8xf32>
    %84 = arith.mulf %82, %83 : vector<8x8x8xf32>
    %cst_31 = arith.constant dense<0xFF800000> : vector<8x8xf32>
    %85 = vector.multi_reduction <maximumf>, %84, %cst_31 [2] : vector<8x8x8xf32> to vector<8x8xf32>
    %86 = vector.shape_cast %85 : vector<8x8xf32> to vector<8x8x1xf32>
    %87 = vector.broadcast %86 : vector<8x8x1xf32> to vector<8x8x8xf32>
    %88 = arith.subf %84, %87 : vector<8x8x8xf32>
    %89 = math.exp %88 : vector<8x8x8xf32>
    %cst_32 = arith.constant dense<0.000000e+00> : vector<8x8xf32>
    %90 = vector.multi_reduction <add>, %89, %cst_32 [2] : vector<8x8x8xf32> to vector<8x8xf32>
    %91 = vector.shape_cast %90 : vector<8x8xf32> to vector<8x8x1xf32>
    %92 = tpu.reciprocal %91 : vector<8x8x1xf32> -> vector<8x8x1xf32>
    %93 = vector.broadcast %92 : vector<8x8x1xf32> to vector<8x8x8xf32>
    %94 = arith.mulf %89, %93 : vector<8x8x8xf32>
    "tpu.trace_start"() <{level = 10 : i32, message = "bqn,bnp->bqp"}> : () -> ()
    %cst_33 = arith.constant dense<0.000000e+00> : vector<8x8x8xf32>
    %95 = tpu.matmul %94, %81, %cst_33 {dimension_numbers = #tpu.dot_dimension_numbers<[2], [1], [1], [2], [0, 0, 0, 1, 1, 2], [0], [0]>} : vector<8x8x8xf32>, vector<8x8x8xf32>, vector<8x8x8xf32> -> vector<8x8x8xf32>
    "tpu.trace_stop"() : () -> ()
    %96 = vector.shape_cast %95 : vector<8x8x8xf32> to vector<64x8xf32>
    %97 = vector.extract_strided_slice %3 {offsets = [16, 0], sizes = [8, 32], strides = [1, 1]} : vector<32x32xf32> to vector<8x32xf32>
    %cst_34 = arith.constant dense<0.000000e+00> : vector<64x32xf32>
    %98 = tpu.matmul %96, %97, %cst_34 {dimension_numbers = #tpu.dot_dimension_numbers<[1], [0], [0], [1], [0, 0, 1, 1], [], []>} : vector<64x8xf32>, vector<8x32xf32>, vector<64x32xf32> -> vector<64x32xf32>
    %99 = arith.addf %73, %98 : vector<64x32xf32>
    %100 = vector.extract_strided_slice %17 {offsets = [0, 24], sizes = [8, 8], strides = [1, 1]} : vector<8x32xf32> to vector<8x8xf32>
    %101 = vector.shape_cast %100 : vector<8x8xf32> to vector<1x8x8xf32>
    %102 = vector.shape_cast %101 : vector<1x8x8xf32> to vector<1x8x8xf32>
    %103 = vector.broadcast %102 : vector<1x8x8xf32> to vector<8x8x8xf32>
    %104 = vector.extract_strided_slice %22 {offsets = [0, 24], sizes = [64, 8], strides = [1, 1]} : vector<64x64xf32> to vector<64x8xf32>
    %105 = vector.shape_cast %104 : vector<64x8xf32> to vector<8x8x8xf32>
    %106 = vector.extract_strided_slice %22 {offsets = [0, 56], sizes = [64, 8], strides = [1, 1]} : vector<64x64xf32> to vector<64x8xf32>
    %107 = vector.shape_cast %106 : vector<64x8xf32> to vector<8x8x8xf32>
    "tpu.trace_start"() <{level = 10 : i32, message = "bqp,bnp->bqn"}> : () -> ()
    %cst_35 = arith.constant dense<0.000000e+00> : vector<8x8x8xf32>
    %108 = tpu.matmul %103, %105, %cst_35 {dimension_numbers = #tpu.dot_dimension_numbers<[2], [2], [1], [1], [0, 0, 0, 1, 1, 1], [0], [0]>} : vector<8x8x8xf32>, vector<8x8x8xf32>, vector<8x8x8xf32> -> vector<8x8x8xf32>
    "tpu.trace_stop"() : () -> ()
    %cst_36 = arith.constant 0.353553385 : f32
    %109 = vector.broadcast %cst_36 : f32 to vector<8x8x8xf32>
    %110 = arith.mulf %108, %109 : vector<8x8x8xf32>
    %cst_37 = arith.constant dense<0xFF800000> : vector<8x8xf32>
    %111 = vector.multi_reduction <maximumf>, %110, %cst_37 [2] : vector<8x8x8xf32> to vector<8x8xf32>
    %112 = vector.shape_cast %111 : vector<8x8xf32> to vector<8x8x1xf32>
    %113 = vector.broadcast %112 : vector<8x8x1xf32> to vector<8x8x8xf32>
    %114 = arith.subf %110, %113 : vector<8x8x8xf32>
    %115 = math.exp %114 : vector<8x8x8xf32>
    %cst_38 = arith.constant dense<0.000000e+00> : vector<8x8xf32>
    %116 = vector.multi_reduction <add>, %115, %cst_38 [2] : vector<8x8x8xf32> to vector<8x8xf32>
    %117 = vector.shape_cast %116 : vector<8x8xf32> to vector<8x8x1xf32>
    %118 = tpu.reciprocal %117 : vector<8x8x1xf32> -> vector<8x8x1xf32>
    %119 = vector.broadcast %118 : vector<8x8x1xf32> to vector<8x8x8xf32>
    %120 = arith.mulf %115, %119 : vector<8x8x8xf32>
    "tpu.trace_start"() <{level = 10 : i32, message = "bqn,bnp->bqp"}> : () -> ()
    %cst_39 = arith.constant dense<0.000000e+00> : vector<8x8x8xf32>
    %121 = tpu.matmul %120, %107, %cst_39 {dimension_numbers = #tpu.dot_dimension_numbers<[2], [1], [1], [2], [0, 0, 0, 1, 1, 2], [0], [0]>} : vector<8x8x8xf32>, vector<8x8x8xf32>, vector<8x8x8xf32> -> vector<8x8x8xf32>
    "tpu.trace_stop"() : () -> ()
    %122 = vector.shape_cast %121 : vector<8x8x8xf32> to vector<64x8xf32>
    %123 = vector.extract_strided_slice %3 {offsets = [24, 0], sizes = [8, 32], strides = [1, 1]} : vector<32x32xf32> to vector<8x32xf32>
    %cst_40 = arith.constant dense<0.000000e+00> : vector<64x32xf32>
    %124 = tpu.matmul %122, %123, %cst_40 {dimension_numbers = #tpu.dot_dimension_numbers<[1], [0], [0], [1], [0, 0, 1, 1], [], []>} : vector<64x8xf32>, vector<8x32xf32>, vector<64x32xf32> -> vector<64x32xf32>
    %125 = arith.addf %99, %124 : vector<64x32xf32>
    %126 = vector.broadcast %8 : vector<1x32xf32> to vector<64x32xf32>
    %127 = arith.addf %125, %126 : vector<64x32xf32>
    %128 = arith.addf %127, %0 : vector<64x32xf32>
    %cst_41 = arith.constant dense<0.000000e+00> : vector<64xf32>
    %129 = vector.multi_reduction <add>, %128, %cst_41 [1] : vector<64x32xf32> to vector<64xf32>
    %130 = vector.shape_cast %129 : vector<64xf32> to vector<64x1xf32>
    %cst_42 = arith.constant 3.200000e+01 : f32
    %131 = vector.broadcast %cst_42 : f32 to vector<64x1xf32>
    %132 = arith.divf %130, %131 : vector<64x1xf32>
    %133 = vector.broadcast %132 : vector<64x1xf32> to vector<64x32xf32>
    %134 = arith.subf %128, %133 : vector<64x32xf32>
    %135 = arith.mulf %134, %134 : vector<64x32xf32>
    %cst_43 = arith.constant dense<0.000000e+00> : vector<64xf32>
    %136 = vector.multi_reduction <add>, %135, %cst_43 [1] : vector<64x32xf32> to vector<64xf32>
    %137 = vector.shape_cast %136 : vector<64xf32> to vector<64x1xf32>
    %cst_44 = arith.constant 3.200000e+01 : f32
    %138 = vector.broadcast %cst_44 : f32 to vector<64x1xf32>
    %139 = arith.divf %137, %138 : vector<64x1xf32>
    %140 = vector.broadcast %132 : vector<64x1xf32> to vector<64x32xf32>
    %141 = arith.subf %128, %140 : vector<64x32xf32>
    %cst_45 = arith.constant 9.99999974E-6 : f32
    %142 = vector.broadcast %cst_45 : f32 to vector<64x1xf32>
    %143 = arith.addf %139, %142 : vector<64x1xf32>
    %144 = math.rsqrt %143 : vector<64x1xf32>
    %145 = vector.broadcast %144 : vector<64x1xf32> to vector<64x32xf32>
    %146 = arith.mulf %141, %145 : vector<64x32xf32>
    %147 = vector.broadcast %9 : vector<1x32xf32> to vector<64x32xf32>
    %148 = arith.mulf %146, %147 : vector<64x32xf32>
    %149 = vector.broadcast %10 : vector<1x32xf32> to vector<64x32xf32>
    %150 = arith.addf %148, %149 : vector<64x32xf32>
    %cst_46 = arith.constant dense<0.000000e+00> : vector<64x32xf32>
    %151 = tpu.matmul %150, %4, %cst_46 {dimension_numbers = #tpu.dot_dimension_numbers<[1], [0], [0], [1], [0, 0, 1, 1], [], []>} : vector<64x32xf32>, vector<32x32xf32>, vector<64x32xf32> -> vector<64x32xf32>
    %152 = vector.broadcast %11 : vector<1x32xf32> to vector<64x32xf32>
    %153 = arith.addf %151, %152 : vector<64x32xf32>
    %cst_47 = arith.constant 0.000000e+00 : f32
    %154 = vector.broadcast %cst_47 : f32 to vector<64x32xf32>
    %155 = arith.maximumf %153, %154 : vector<64x32xf32>
    %156 = arith.addf %150, %155 : vector<64x32xf32>
    %cst_48 = arith.constant dense<0.000000e+00> : vector<64xf32>
    %157 = vector.multi_reduction <add>, %156, %cst_48 [1] : vector<64x32xf32> to vector<64xf32>
    %158 = vector.shape_cast %157 : vector<64xf32> to vector<64x1xf32>
    %cst_49 = arith.constant 3.200000e+01 : f32
    %159 = vector.broadcast %cst_49 : f32 to vector<64x1xf32>
    %160 = arith.divf %158, %159 : vector<64x1xf32>
    %161 = vector.broadcast %160 : vector<64x1xf32> to vector<64x32xf32>
    %162 = arith.subf %156, %161 : vector<64x32xf32>
    %163 = arith.mulf %162, %162 : vector<64x32xf32>
    %cst_50 = arith.constant dense<0.000000e+00> : vector<64xf32>
    %164 = vector.multi_reduction <add>, %163, %cst_50 [1] : vector<64x32xf32> to vector<64xf32>
    %165 = vector.shape_cast %164 : vector<64xf32> to vector<64x1xf32>
    %cst_51 = arith.constant 3.200000e+01 : f32
    %166 = vector.broadcast %cst_51 : f32 to vector<64x1xf32>
    %167 = arith.divf %165, %166 : vector<64x1xf32>
    %168 = vector.broadcast %160 : vector<64x1xf32> to vector<64x32xf32>
    %169 = arith.subf %156, %168 : vector<64x32xf32>
    %cst_52 = arith.constant 9.99999974E-6 : f32
    %170 = vector.broadcast %cst_52 : f32 to vector<64x1xf32>
    %171 = arith.addf %167, %170 : vector<64x1xf32>
    %172 = math.rsqrt %171 : vector<64x1xf32>
    %173 = vector.broadcast %172 : vector<64x1xf32> to vector<64x32xf32>
    %174 = arith.mulf %169, %173 : vector<64x32xf32>
    %175 = vector.broadcast %12 : vector<1x32xf32> to vector<64x32xf32>
    %176 = arith.mulf %174, %175 : vector<64x32xf32>
    %177 = vector.broadcast %13 : vector<1x32xf32> to vector<64x32xf32>
    %178 = arith.addf %176, %177 : vector<64x32xf32>
    %c0_53 = arith.constant 0 : index
    %c0_54 = arith.constant 0 : index
    %179 = vector.load %arg9[%c0_53, %c0_54] : memref<64x32xf32, #tpu.memory_space<vmem>>, vector<64x32xf32>
    tpu.vector_store %arg9[%c0_53, %c0_54], %178 {strides = array<i32>} : memref<64x32xf32, #tpu.memory_space<vmem>>, vector<64x32xf32>,
    return
  }
  func.func @transform_0(%arg0: i32) -> (i32, i32, i32) {
    %c0_i32 = arith.constant 0 : i32
    %c0_i32_0 = arith.constant 0 : i32
    %c0_i32_1 = arith.constant 0 : i32
    return %arg0, %c0_i32, %c0_i32_0 : i32, i32, i32
  }
  func.func @transform_1(%arg0: i32) -> (i32, i32) {
    %c0_i32 = arith.constant 0 : i32
    %c0_i32_0 = arith.constant 0 : i32
    %c0_i32_1 = arith.constant 0 : i32
    return %c0_i32, %c0_i32_0 : i32, i32
  }
  func.func @transform_2(%arg0: i32) -> (i32, i32) {
    %c0_i32 = arith.constant 0 : i32
    %c0_i32_0 = arith.constant 0 : i32
    %c0_i32_1 = arith.constant 0 : i32
    return %c0_i32, %c0_i32_0 : i32, i32
  }
  func.func @transform_3(%arg0: i32) -> (i32, i32) {
    %c0_i32 = arith.constant 0 : i32
    %c0_i32_0 = arith.constant 0 : i32
    %c0_i32_1 = arith.constant 0 : i32
    return %c0_i32, %c0_i32_0 : i32, i32
  }
  func.func @transform_4(%arg0: i32) -> (i32, i32) {
    %c0_i32 = arith.constant 0 : i32
    %c0_i32_0 = arith.constant 0 : i32
    %c0_i32_1 = arith.constant 0 : i32
    return %c0_i32, %c0_i32_0 : i32, i32
  }
  func.func @transform_5(%arg0: i32) -> (i32, i32) {
    %c0_i32 = arith.constant 0 : i32
    %c0_i32_0 = arith.constant 0 : i32
    %c0_i32_1 = arith.constant 0 : i32
    return %c0_i32, %c0_i32_0 : i32, i32
  }
  func.func @transform_6(%arg0: i32) -> (i32, i32) {
    %c0_i32 = arith.constant 0 : i32
    %c0_i32_0 = arith.constant 0 : i32
    %c0_i32_1 = arith.constant 0 : i32
    return %c0_i32, %c0_i32_0 : i32, i32
  }
  func.func @transform_7(%arg0: i32) -> (i32, i32) {
    %c0_i32 = arith.constant 0 : i32
    %c0_i32_0 = arith.constant 0 : i32
    %c0_i32_1 = arith.constant 0 : i32
    return %c0_i32, %c0_i32_0 : i32, i32
  }
  func.func @transform_8(%arg0: i32) -> (i32, i32) {
    %c0_i32 = arith.constant 0 : i32
    %c0_i32_0 = arith.constant 0 : i32
    return %arg0, %c0_i32 : i32, i32
  }
}

</mosaic_0001>

<bundles_post_ra>
// kernel: tpu_custom_call.1
= control target key start
LH: loop header
LB: loop body
LE: loop exit
PB: predicated region body
PF: predicated region fallthrough
CT: control target
= control target key end

     0   :  { %13 = vsyncpa [#allocation3], 0  ;;  %s8580_s0 = inlined_call_operand.vmem [shape: f32[8,8,32], index: 0, kind: input, shape index: {}]   ;;  %s8581_s1 = inlined_call_operand.vmem [shape: f32[64,32], index: 1, kind: input, shape index: {}]   ;;  %s8582_s2 = inlined_call_operand.vmem [shape: f32[32,32], index: 2, kind: input, shape index: {}]   ;;  %s8583_s3 = inlined_call_operand.hbm [shape: f32[32,64], index: 3, kind: input, shape index: {}]   ;;  %s8584_s4 = inlined_call_operand.hbm [shape: f32[32,32], index: 4, kind: input, shape index: {}]   ;;  %s8585_s5 = inlined_call_operand.hbm [shape: f32[32,32], index: 5, kind: input, shape index: {}]   ;;  %s8586_s6 = inlined_call_operand.vmem [shape: f32[1,64], index: 6, kind: input, shape index: {}]   ;;  %s8587_s7 = inlined_call_operand.vmem [shape: f32[7,32], index: 7, kind: input, shape index: {}]   ;;  %s8588_s8 = inlined_call_operand.vmem [shape: f32[64,32], index: 8, kind: output, shape index: {}]  }
   0x1   :  { %14 = vsyncpa [#allocation5], 0  ;;  %s7486_s27 = smov [#allocation4]   ;;  %s7487_s29 = smov [#allocation2]  }
   0x2   :  { %s38_s28 = sshll.u32 %s7486_s27, 4  ;;  %s26_s30 = sshll.u32 %s7487_s29, 4  ;;  %s39_s28 = int_to_ptr.vmem [resolvable:$true] %s38_s28  ;;  %s27_s30 = int_to_ptr.vmem [resolvable:$true] %s26_s30 }
   0x3   :  { %s7430_s9 = scalar_lea.vmem %s39_s28, 512  ;;  %p7435_p1 = scmp.lt.s32.totalorder %s39_s28, %s39_s28 }
   0x4   :  { %p7431_p0 = scmp.ne.s32.totalorder %s39_s28, %s7430_s9  ;;  %p7436_p2 = scmp.lt.s32.totalorder %s7430_s9, %s7430_s9 }
   0x6   :  { %p7437_p3 = por %p7436_p2, %p7435_p1 }
   0x8   :  { %p7438_p4 = pnand %p7437_p3, %p7431_p0 }
   0xa   :  { %7441 = shalt.err (!%p7438_p4)
}
   0xb   :  { %s7488_s10 = smov 128   ;;  %s7489_s11 = smov 8  }
   0xc   :  { %44 = dma.hbm_to_vmem [thread:$0]  %s8584_s4, 512, %s39_s28, [#allocation5], %s7488_s10, %s7488_s10, %s7489_s11  }
   0xd   :  { %s7450_s14 = scalar_lea.vmem %s27_s30, 512  ;;  %p7455_p6 = scmp.lt.s32.totalorder %s27_s30, %s27_s30 }
   0xe   :  { %p7451_p5 = scmp.ne.s32.totalorder %s27_s30, %s7450_s14  ;;  %p7456_p7 = scmp.lt.s32.totalorder %s7450_s14, %s7450_s14 }
  0x10   :  { %p7457_p8 = por %p7456_p7, %p7455_p6 }
  0x12   :  { %p7458_p9 = pnand %p7457_p8, %p7451_p5 }
  0x14   :  { %7461 = shalt.err (!%p7458_p9)
}
  0x15   :  { %32 = dma.hbm_to_vmem [thread:$0]  %s8583_s3, 512, %s27_s30, [#allocation3], %s7488_s10, %s7488_s10, %s7489_s11  }
  0x16   :  { %s7490_s17 = smov [#allocation6]  }
  0x17   :  { %s50_s18 = sshll.u32 %s7490_s17, 4  ;;  %s51_s18 = int_to_ptr.vmem [resolvable:$true] %s50_s18 }
  0x18   :  { %s7470_s19 = scalar_lea.vmem %s51_s18, 512  ;;  %p7475_p11 = scmp.lt.s32.totalorder %s51_s18, %s51_s18 }
  0x19   :  { %p7471_p10 = scmp.ne.s32.totalorder %s51_s18, %s7470_s19  ;;  %p7476_p12 = scmp.lt.s32.totalorder %s7470_s19, %s7470_s19 }
  0x1b   :  { %p7477_p13 = por %p7476_p12, %p7475_p11 }
  0x1d   :  { %p7478_p0 = pnand %p7477_p13, %p7471_p10 }
  0x1f   :  { %7481 = shalt.err (!%p7478_p0)
}
  0x20   :  { %56 = dma.hbm_to_vmem [thread:$0]  %s8585_s5, 512, %s51_s18, [#allocation5], %s7488_s10, %s7488_s10, %s7489_s11  }
  0x21   :  { %7482 = dma.done.wait [#allocation3], 512  }
  0x22   :  { %7483 = vsyncadd [#allocation3], 4294966784 }
  0x23   :  { %7484 = dma.done.wait [#allocation5], 1024  }
  0x24   :  { %7485 = vsyncadd [#allocation5], 4294966272  ;;  %v7491_v0 = vmov 0.0   ;;  %vm7492_vm0 = vmmov 0   ;;  %v85_v1 = vld [vmem:[#allocation2 + $0x18] sm:$0xff]  ;;  %v84_v2 = vld [vmem:[#allocation2 + $0x10] sm:$0xff]  ;;  %v96_v18 = vlaneseq }
  0x25   :  { %6820 = vmatprep.subr.mxu0 %v7491_v0  ;;  %6828 = vmatprep.mubr.msk.f32.mxu0 %vm7492_vm0, %v7491_v0  ;;  %v81_v3 = vld [vmem:[%s8582_s2 + $0x18] sm:$0xff]  ;;  %v80_v4 = vld [vmem:[%s8582_s2 + $0x10] sm:$0xff]  ;;  %v83_v5 = vld [vmem:[#allocation2 + $0x8] sm:$0xff]  ;;  %vm100_vm1 = vcmask 261120   ;;  %vm317_vm2 = vcmask 64512   ;;  %s7495_s5 = smov 88  }
  0x26   :  { %6831 = vmatprep.subr.mxu1 %v85_v1  ;;  %6821 = vmatpush3.msra.mxu0 %v81_v3  ;;  %v174_v6 = vld [vmem:[%s8580_s0] sm:$0xff]  ;;  %v79_v8 = vld [vmem:[%s8582_s2 + $0x8] sm:$0xff]  ;;  %v176_v11 = vld [vmem:[%s8580_s0 + $0x10] sm:$0xff]  ;;  %v97_v19 = vshrl.u32 %v96_v18, 7  ;;  %s7496_s23 = smov 112   ;;  %s7497_s24 = smov 80  }
  0x27   :  { %6832 = vmatpush3.msra.mxu1 %v85_v1  ;;  %6822 = vmatprep.subr.mxu0 %v7491_v0  ;;  %v82_v7 = vld [vmem:[#allocation2] sm:$0xff]  ;;  %v175_v9 = vld [vmem:[%s8580_s0 + $0x8] sm:$0xff]  ;;  %v177_v13 = vld [vmem:[%s8580_s0 + $0x18] sm:$0xff]  ;;  %s7498_s25 = smov 104   ;;  %s7499_s26 = smov 72  }
  0x28   :  { %6833 = vmatprep.subr.mxu1 %v84_v2  ;;  %6823 = vmatpush3.msra.mxu0 %v80_v4  ;;  %v78_v10 = vld [vmem:[%s8582_s2] sm:$0xff]  ;;  %v179_v15 = vld [vmem:[%s8580_s0 + $0x28] sm:$0xff]  ;;  %v180_v16 = vld [vmem:[%s8580_s0 + $0x30] sm:$0xff]  ;;  %v6043_v20 = vsub.s32 1, %v97_v19  ;;  %v6168_v21 = vsub.s32 2, %v97_v19  ;;  %v6180_v22 = vsub.s32 3, %v97_v19 }
  0x29   :  { %6834 = vmatpush3.msra.mxu1 %v84_v2  ;;  %6839 = vmatprep.mubr.msk.f32.mxu1 %vm100_vm1, %v174_v6  ;;  %v70_v12 = vld [vmem:[%s8581_s1] sm:$0xff]  ;;  %v181_v17 = vld [vmem:[%s8580_s0 + $0x38] sm:$0xff]  ;;  %v6192_v23 = vsub.s32 4, %v97_v19  ;;  %v6445_v25 = vsub.s32 5, %v97_v19  ;;  %v6457_v26 = vsub.s32 6, %v97_v19  ;;  %v98_v33 = vsub.s32 0, %v97_v19 }
  0x2a   :  { %6835 = vmatprep.subr.mxu1 %v83_v5  ;;  %6824 = vmatprep.subr.mxu0 %v7491_v0  ;;  %v178_v14 = vld [vmem:[%s8580_s0 + $0x20] sm:$0xff] }
  0x2b   :  { %6836 = vmatpush3.msra.mxu1 %v83_v5  ;;  %6825 = vmatpush3.msra.mxu0 %v79_v8  ;;  %v95_v24 = vld [vmem:[%s8587_s7] sm:$0x7f]  ;;  %s7494_s7 = smov 120  }
  0x2c   :  { %6837 = vmatprep.subr.mxu1 %v82_v7  ;;  %6826 = vmatprep.subr.mxu0 %v7491_v0  ;;  %v7617_v27 = vrot.slane %v95_v24, %v6043_v20  ;;  %v7619_v28 = vrot.slane %v95_v24, %v6168_v21  ;;  %v7621_v29 = vrot.slane %v95_v24, %v6180_v22  ;;  %v6482_v34 = vld [vmem:[%s8586_s6] ss:$0 sm:$0xff]  ;;  %s7493_s6 = smov 96  }
  0x2d   :  { %6838 = vmatpush3.msra.mxu1 %v82_v7  ;;  %6827 = vmatpush3.msra.mxu0 %v78_v10  ;;  %v7623_v30 = vrot.slane %v95_v24, %v6192_v23  ;;  %v7625_v31 = vrot.slane %v95_v24, %v6445_v25  ;;  %v7627_v32 = vrot.slane %v95_v24, %v6457_v26 }
  0x2e   :  { %6840 = vmatmul.mubr.msk.f32.vlgmr.msra.gmra.mxu1 %vm100_vm1, %v175_v9  ;;  %6829 = vmatmul.mubr.msk.f32.vlgmr.msra.gmra.mxu0 %vm100_vm1, %v70_v12  ;;  %v99_v35 = vrot.slane %v95_v24, %v98_v33 }
  0x2f   :  { %6842 = vmatprep.mubr.msk.f32.mxu1 %vm100_vm1, %v176_v11  ;;  %6856 = vmatprep.subr.mxu0 %v7491_v0 }
  0x30   :  { %6851 = vmatprep.subr.mxu1 %v7491_v0  ;;  %6858 = vmatprep.mubr.msk.f32.mxu0 %vm7492_vm0, %v7491_v0 }
  0x32   :  { %6843 = vmatmul.mubr.msk.f32.gmra.mxu1 %vm100_vm1, %v177_v13 }
  0x33   :  { %6845 = vmatprep.mubr.msk.f32.mxu1 %vm100_vm1, %v178_v14 }
  0x36   :  { %6846 = vmatmul.mubr.msk.f32.gmra.mxu1 %vm100_vm1, %v179_v15 }
  0x37   :  { %6848 = vmatprep.mubr.msk.f32.mxu1 %vm100_vm1, %v180_v16 }
  0x3a   :  { %6849 = vmatmul.mubr.msk.f32.gmra.mxu1 %vm100_vm1, %v181_v17 }
  0x3b   :  { %6853 = vmatprep.mubr.msk.f32.mxu1 %vm7492_vm0, %v7491_v0 }
  0xee   :  { %v6841_v36 = vpop.f32.mrf.mxu1  ;;  %v170_v38 = vpop.f32.mrf.mxu0 }
  0xef   :  { %v7632_v37 = vadd.f32 %v6841_v36, %v6482_v34  ;;  %v7634_v40 = vadd.f32 %v170_v38, %v99_v35 }
  0xf0   :  { %v278_v39 = vpop.f32.mrf.mxu1  ;;  %v6830_v42 = vpop.f32.mrf.mxu0 }
  0xf1   :  { %v7636_v41 = vadd.f32 %v6482_v34, %v278_v39  ;;  %6857 = vmatpush3.xpose.msk.msra.mxu0 %vm317_vm2, %v7632_v37 }
  0xf2   :  { %v6844_v43 = vpop.f32.mrf.mxu1  ;;  %6861 = vmatprep.subr.mxu0 %v7491_v0 }
  0xf3   :  { %6852 = vmatpush3.xpose.msk.msra.mxu1 %vm317_vm2, %v7636_v41  ;;  %v7657_v48 = vadd.f32 %v6844_v43, %v6482_v34 }
  0xf4   :  { %v288_v44 = vpop.f32.mrf.mxu1  ;;  %6859 = vmatmul.mubr.msk.f32.vlgmr.msra.gmra.mxu0 %vm317_vm2, %v7634_v40  ;;  %6871 = vmatprep.subr.mxu1 %v7491_v0 }
  0xf5   :  { %v7646_v45 = vadd.f32 %v6482_v34, %v288_v44  ;;  %6863 = vmatprep.mubr.msk.f32.mxu0 %vm7492_vm0, %v7491_v0 }
  0xf6   :  { %v6847_v46 = vpop.f32.mrf.mxu1  ;;  %6854 = vmatmul.mubr.msk.f32.vlgmr.msra.gmra.mxu1 %vm317_vm2, %v7634_v40 }
  0xf7   :  { %6862 = vmatpush3.xpose.msk.msra.mxu0 %vm317_vm2, %v7646_v45  ;;  %6873 = vmatprep.mubr.msk.f32.mxu1 %vm7492_vm0, %v7491_v0  ;;  %v7663_v51 = vadd.f32 %v6847_v46, %v6482_v34 }
  0xf8   :  { %v298_v47 = vpop.f32.mrf.mxu1  ;;  %6866 = vmatprep.subr.mxu0 %v7491_v0 }
  0xf9   :  { %v7659_v49 = vadd.f32 %v6482_v34, %v298_v47 }
  0xfa   :  { %v6850_v50 = vpop.f32.mrf.mxu1  ;;  %6864 = vmatmul.mubr.msk.f32.vlgmr.msra.gmra.mxu0 %vm317_vm2, %v7634_v40 }
  0xfb   :  { %6867 = vmatpush3.xpose.msk.msra.mxu0 %vm317_vm2, %v7657_v48  ;;  %6872 = vmatpush3.xpose.msk.msra.mxu1 %vm317_vm2, %v7659_v49  ;;  %v7679_v54 = vadd.f32 %v6850_v50, %v6482_v34 }
  0xfc   :  { %v308_v52 = vpop.f32.mrf.mxu1  ;;  %6868 = vmatprep.mubr.msk.f32.mxu0 %vm7492_vm0, %v7491_v0  ;;  %6876 = vmatprep.subr.mxu0 %v7491_v0 }
  0xfd   :  { %v7672_v53 = vadd.f32 %v6482_v34, %v308_v52  ;;  %6881 = vmatprep.subr.mxu1 %v7491_v0 }
  0xfe   :  { %6869 = vmatmul.mubr.msk.f32.vlgmr.msra.gmra.mxu0 %vm317_vm2, %v7634_v40  ;;  %6874 = vmatmul.mubr.msk.f32.vlgmr.msra.gmra.mxu1 %vm317_vm2, %v7634_v40 }
  0xff   :  { %6877 = vmatpush3.xpose.msk.msra.mxu0 %vm317_vm2, %v7663_v51  ;;  %6882 = vmatpush3.xpose.msk.msra.mxu1 %vm317_vm2, %v7672_v53 }
 0x100   :  { %6878 = vmatprep.mubr.msk.f32.mxu0 %vm7492_vm0, %v7491_v0  ;;  %6883 = vmatprep.mubr.msk.f32.mxu1 %vm7492_vm0, %v7491_v0 }
 0x101   :  { %6886 = vmatprep.subr.mxu0 %v7491_v0  ;;  %6891 = vmatprep.subr.mxu1 %v7491_v0 }
 0x102   :  { %6879 = vmatmul.mubr.msk.f32.vlgmr.msra.gmra.mxu0 %vm317_vm2, %v7634_v40  ;;  %6884 = vmatmul.mubr.msk.f32.vlgmr.msra.gmra.mxu1 %vm317_vm2, %v7634_v40 }
 0x103   :  { %6887 = vmatpush3.xpose.msk.msra.mxu0 %vm317_vm2, %v7679_v54  ;;  %6888 = vmatprep.mubr.msk.f32.mxu0 %vm7492_vm0, %v7491_v0 }
 0x104   :  { %6896 = vmatprep.subr.mxu0 %v7491_v0  ;;  %6893 = vmatprep.mubr.msk.f32.mxu1 %vm7492_vm0, %v7491_v0 }
 0x106   :  { %6889 = vmatmul.mubr.msk.f32.vlgmr.msra.gmra.mxu0 %vm317_vm2, %v7634_v40 }
 0x107   :  { %6898 = vmatprep.mubr.msk.f32.mxu0 %vm7492_vm0, %v7491_v0 }
 0x1b4   :  { %v463_v55 = vpop.f32.mrf.mxu0 }
 0x1b5   :  { %v906_v60 = vmul.f32 0.35355338, %v463_v55 }
 0x1b6   :  { %v390_v56 = vpop.f32.mrf.mxu1  ;;  %v6860_v57 = vpop.f32.mrf.mxu0 }
 0x1b7   :  { %v905_v58 = vmul.f32 0.35355338, %v390_v56  ;;  %v916_v2 = vsel %vm317_vm2, %v906_v60, -inf }
 0x1b8   :  { %v6855_v59 = vpop.f32.mrf.mxu1 }
 0x1b9   :  { %v913_v61 = vsel %vm317_vm2, %v905_v58, -inf }
 0x1ba   :  { %914 = vmax.xlane.f32.xlu0 %v913_v61  ;;  %v536_v62 = vpop.f32.mrf.mxu0 }
 0x1bb   :  { %v907_v63 = vmul.f32 0.35355338, %v536_v62 }
 0x1bc   :  { %v6865_v1 = vpop.f32.mrf.mxu0 }
 0x1bd   :  { %v919_v3 = vsel %vm317_vm2, %v907_v63, -inf }
 0x1be   :  { %v682_v4 = vpop.f32.mrf.mxu1  ;;  %917 = vmax.xlane.f32.xlu0 %v916_v2  ;;  %920 = vmax.xlane.f32.xlu1 %v919_v3  ;;  %v609_v5 = vpop.f32.mrf.mxu0 }
 0x1bf   :  { %v909_v6 = vmul.f32 0.35355338, %v682_v4  ;;  %v908_v7 = vmul.f32 0.35355338, %v609_v5 }
 0x1c0   :  { %v6870_v8 = vpop.f32.mrf.mxu0  ;;  %v6875_v9 = vpop.f32.mrf.mxu1 }
 0x1c1   :  { %v925_v10 = vsel %vm317_vm2, %v909_v6, -inf  ;;  %v922_v11 = vsel %vm317_vm2, %v908_v7, -inf }
 0x1c2   :  { %v828_v12 = vpop.f32.mrf.mxu1  ;;  %926 = vmax.xlane.f32.xlu0 %v925_v10  ;;  %923 = vmax.xlane.f32.xlu1 %v922_v11  ;;  %v755_v13 = vpop.f32.mrf.mxu0 }
 0x1c3   :  { %v911_v14 = vmul.f32 0.35355338, %v828_v12  ;;  %v910_v15 = vmul.f32 0.35355338, %v755_v13 }
 0x1c4   :  { %v6880_v16 = vpop.f32.mrf.mxu0  ;;  %v6885_v17 = vpop.f32.mrf.mxu1 }
 0x1c5   :  { %v931_v18 = vsel %vm317_vm2, %v911_v14, -inf  ;;  %v928_v19 = vsel %vm317_vm2, %v910_v15, -inf }
 0x1c6   :  { %932 = vmax.xlane.f32.xlu0 %v931_v18  ;;  %929 = vmax.xlane.f32.xlu1 %v928_v19  ;;  %v901_v20 = vpop.f32.mrf.mxu0 }
 0x1c7   :  { %v7723_v22 = vmul.f32 0.35355338, %v901_v20 }
 0x1c8   :  { %v6890_v21 = vpop.f32.mrf.mxu0 }
 0x1c9   :  { %v934_v23 = vsel %vm317_vm2, %v7723_v22, -inf }
 0x1d7   :  { %1077 = vrot.lane.b32.xlu1 %v7632_v37, %s7493_s6 }
 0x1db   :  { %1153 = vrot.lane.b32.xlu1 %v7646_v45, %s7493_s6 }
 0x1dc   :  { %1001 = vrot.lane.b32.xlu0 %v7636_v41, %s7493_s6 }
 0x1df   :  { %1229 = vrot.lane.b32.xlu1 %v7657_v48, %s7493_s6 }
 0x1e0   :  { %1305 = vrot.lane.b32.xlu0 %v7659_v49, %s7493_s6 }
 0x1e3   :  { %1381 = vrot.lane.b32.xlu1 %v7663_v51, %s7493_s6 }
 0x1e4   :  { %1457 = vrot.lane.b32.xlu0 %v7672_v53, %s7493_s6 }
 0x1e7   :  { %1533 = vrot.lane.b32.xlu1 %v7679_v54, %s7493_s6 }
 0x1e8   :  { %1611 = vrot.lane.b32.xlu0 %v7636_v41, %s7494_s7 }
 0x20b   :  { %935 = vmax.xlane.f32.xlu1 %v934_v23 }
 0x21c   :  { %1687 = vrot.lane.b32.xlu1 %v7632_v37, %s7494_s7 }
 0x243   :  { %v915_v24 = vpop.xlane.xlu0 %914 }
 0x244   :  { %v937_v25 = vsub.f32 %v905_v58, %v915_v24 }
 0x246   :  { %v945_v26 = vmul.f32 1.442695, %v937_v25 }
 0x247   :  { %v918_v33 = vpop.xlane.xlu0 %917  ;;  %v921_v34 = vpop.xlane.xlu1 %920 }
 0x248   :  { %7261 = vpow2.f32 %v945_v26  ;;  %v938_v35 = vsub.f32 %v906_v60, %v918_v33  ;;  %v939_v36 = vsub.f32 %v907_v63, %v921_v34 }
 0x24a   :  { %v947_v38 = vmul.f32 1.442695, %v938_v35  ;;  %v949_v39 = vmul.f32 1.442695, %v939_v36 }
 0x24b   :  { %v927_v42 = vpop.xlane.xlu0 %926  ;;  %v924_v43 = vpop.xlane.xlu1 %923 }
 0x24c   :  { %7263 = vpow2.f32 %v947_v38  ;;  %v941_v44 = vsub.f32 %v909_v6, %v927_v42  ;;  %v940_v46 = vsub.f32 %v908_v7, %v924_v43 }
 0x24d   :  { %7265 = vpow2.f32 %v949_v39 }
 0x24e   :  { %v953_v47 = vmul.f32 1.442695, %v941_v44  ;;  %v951_v50 = vmul.f32 1.442695, %v940_v46 }
 0x24f   :  { %v933_v52 = vpop.xlane.xlu0 %932  ;;  %v930_v55 = vpop.xlane.xlu1 %929 }
 0x250   :  { %7267 = vpow2.f32 %v953_v47  ;;  %v943_v56 = vsub.f32 %v911_v14, %v933_v52  ;;  %v942_v57 = vsub.f32 %v910_v15, %v930_v55 }
 0x251   :  { %7269 = vpow2.f32 %v951_v50 }
 0x252   :  { %v957_v58 = vmul.f32 1.442695, %v943_v56  ;;  %v955_v59 = vmul.f32 1.442695, %v942_v57 }
 0x253   :  { %v1002_v60 = vpop.permute.xlu0 %1001  ;;  %v1078_v61 = vpop.permute.xlu1 %1077 }
 0x254   :  { %7271 = vpow2.f32 %v957_v58  ;;  %6892 = vmatpush3.msra.mxu1 %v1002_v60  ;;  %6897 = vmatpush3.msra.mxu0 %v1078_v61 }
 0x255   :  { %v7262_v62 = vpop.eup %7261  ;;  %7273 = vpow2.f32 %v955_v59  ;;  %6901 = vmatprep.subr.mxu1 %v7491_v0  ;;  %6906 = vmatprep.subr.mxu0 %v7491_v0 }
 0x256   :  { %v961_v63 = vsel %vm317_vm2, %v7262_v62, 0.0 }
 0x257   :  { %962 = vadd.xlane.f32.xlu0 %v961_v63  ;;  %v1154_v13 = vpop.permute.xlu1 %1153  ;;  %v1306_v23 = vpop.permute.xlu0 %1305 }
 0x259   :  { %v7264_v1 = vpop.eup %7263 }
 0x25a   :  { %v7266_v2 = vpop.eup %7265  ;;  %v964_v3 = vsel %vm317_vm2, %v7264_v1, 0.0 }
 0x25b   :  { %v967_v4 = vsel %vm317_vm2, %v7266_v2, 0.0  ;;  %965 = vadd.xlane.f32.xlu1 %v964_v3  ;;  %v1230_v14 = vpop.permute.xlu1 %1229  ;;  %v1458_v24 = vpop.permute.xlu0 %1457 }
 0x25c   :  { %968 = vadd.xlane.f32.xlu0 %v967_v4 }
 0x25d   :  { %v7734_v5 = vpop.eup %7267 }
 0x25e   :  { %v7736_v6 = vpop.eup %7269  ;;  %v973_v7 = vsel %vm317_vm2, %v7734_v5, 0.0 }
 0x25f   :  { %v970_v8 = vsel %vm317_vm2, %v7736_v6, 0.0  ;;  %v1382_v15 = vpop.permute.xlu1 %1381  ;;  %v1612_v25 = vpop.permute.xlu0 %1611 }
 0x260   :  { %974 = vadd.xlane.f32.xlu0 %v973_v7  ;;  %971 = vadd.xlane.f32.xlu1 %v970_v8 }
 0x261   :  { %v7742_v9 = vpop.eup %7271 }
 0x262   :  { %v7744_v10 = vpop.eup %7273  ;;  %v979_v11 = vsel %vm317_vm2, %v7742_v9, 0.0 }
 0x263   :  { %v976_v12 = vsel %vm317_vm2, %v7744_v10, 0.0  ;;  %v7760_v16 = vpop.permute.xlu1 %1533 }
 0x264   :  { %980 = vadd.xlane.f32.xlu0 %v979_v11  ;;  %977 = vadd.xlane.f32.xlu1 %v976_v12 }
 0x275   :  { %1761 = vrot.lane.b32.xlu1 %v7646_v45, %s7494_s7 }
 0x27a   :  { %1609 = vrot.lane.b32.xlu0 %v7634_v40, %s7494_s7 }
 0x27e   :  { %1835 = vrot.lane.b32.xlu0 %v7657_v48, %s7494_s7 }
 0x282   :  { %1983 = vrot.lane.b32.xlu0 %v7663_v51, %s7494_s7 }
 0x286   :  { %2131 = vrot.lane.b32.xlu0 %v7679_v54, %s7494_s7 }
 0x294   :  { %v936_v17 = vpop.xlane.xlu1 %935 }
 0x295   :  { %v944_v18 = vsub.f32 %v7723_v22, %v936_v17 }
 0x297   :  { %v959_v19 = vmul.f32 1.442695, %v944_v18 }
 0x298   :  { %v7771_v26 = vpop.permute.xlu1 %1687 }
 0x299   :  { %7275 = vpow2.f32 %v959_v19 }
 0x2a6   :  { %v7763_v20 = vpop.eup %7275 }
 0x2a7   :  { %v982_v21 = vsel %vm317_vm2, %v7763_v20, 0.0 }
 0x2a8   :  { %983 = vadd.xlane.f32.xlu1 %v982_v21 }
 0x2b9   :  { %1909 = vrot.lane.b32.xlu1 %v7659_v49, %s7494_s7 }
 0x2bd   :  { %2057 = vrot.lane.b32.xlu1 %v7672_v53, %s7494_s7 }
 0x2e0   :  { %v963_v22 = vpop.xlane.xlu0 %962 }
 0x2e1   :  { %7277 = vrcp.f32 %v963_v22 }
 0x2e4   :  { %v966_v33 = vpop.xlane.xlu1 %965 }
 0x2e5   :  { %v969_v34 = vpop.xlane.xlu0 %968  ;;  %7279 = vrcp.f32 %v966_v33 }
 0x2e6   :  { %7281 = vrcp.f32 %v969_v34 }
 0x2e9   :  { %v975_v35 = vpop.xlane.xlu0 %974  ;;  %v972_v36 = vpop.xlane.xlu1 %971 }
 0x2ea   :  { %7283 = vrcp.f32 %v975_v35 }
 0x2eb   :  { %7285 = vrcp.f32 %v972_v36 }
 0x2ed   :  { %v981_v38 = vpop.xlane.xlu0 %980  ;;  %v978_v39 = vpop.xlane.xlu1 %977 }
 0x2ee   :  { %v7278_v42 = vpop.eup %7277  ;;  %7287 = vrcp.f32 %v981_v38 }
 0x2ef   :  { %7289 = vrcp.f32 %v978_v39  ;;  %v993_v43 = vmul.f32 %v7278_v42, %v7262_v62 }
 0x2f1   :  { %6894 = vmatmul.mubr.msk.f32.vlgmr.msra.gmra.mxu1 %vm317_vm2, %v993_v43  ;;  %v1610_v62 = vpop.permute.xlu0 %1609  ;;  %v1762_v63 = vpop.permute.xlu1 %1761 }
 0x2f2   :  { %v7280_v44 = vpop.eup %7279  ;;  %6902 = vmatpush3.msra.mxu1 %v1154_v13  ;;  %6903 = vmatprep.mubr.msk.f32.mxu1 %vm7492_vm0, %v7491_v0 }
 0x2f3   :  { %v7282_v46 = vpop.eup %7281  ;;  %6911 = vmatprep.subr.mxu1 %v7491_v0  ;;  %v994_v47 = vmul.f32 %v7280_v44, %v7264_v1 }
 0x2f4   :  { %v995_v50 = vmul.f32 %v7282_v46, %v7266_v2 }
 0x2f5   :  { %6899 = vmatmul.mubr.msk.f32.vlgmr.msra.gmra.mxu0 %vm317_vm2, %v994_v47 }
 0x2f6   :  { %6904 = vmatmul.mubr.msk.f32.vlgmr.msra.gmra.mxu1 %vm317_vm2, %v995_v50  ;;  %6907 = vmatpush3.msra.mxu0 %v1230_v14 }
 0x2f7   :  { %v7284_v52 = vpop.eup %7283  ;;  %6912 = vmatpush3.msra.mxu1 %v1306_v23  ;;  %6908 = vmatprep.mubr.msk.f32.mxu0 %vm7492_vm0, %v7491_v0 }
 0x2f8   :  { %v7286_v55 = vpop.eup %7285  ;;  %6913 = vmatprep.mubr.msk.f32.mxu1 %vm7492_vm0, %v7491_v0  ;;  %6916 = vmatprep.subr.mxu0 %v7491_v0  ;;  %v997_v56 = vmul.f32 %v7284_v52, %v7734_v5 }
 0x2f9   :  { %6921 = vmatprep.subr.mxu1 %v7491_v0  ;;  %v996_v57 = vmul.f32 %v7286_v55, %v7736_v6  ;;  %v1836_v6 = vpop.permute.xlu0 %1835 }
 0x2fa   :  { %6914 = vmatmul.mubr.msk.f32.vlgmr.msra.gmra.mxu1 %vm317_vm2, %v997_v56 }
 0x2fb   :  { %v7288_v58 = vpop.eup %7287  ;;  %6909 = vmatmul.mubr.msk.f32.vlgmr.msra.gmra.mxu0 %vm317_vm2, %v996_v57  ;;  %6922 = vmatpush3.msra.mxu1 %v1458_v24 }
 0x2fc   :  { %v7290_v59 = vpop.eup %7289  ;;  %6917 = vmatpush3.msra.mxu0 %v1382_v15  ;;  %6918 = vmatprep.mubr.msk.f32.mxu0 %vm7492_vm0, %v7491_v0  ;;  %v999_v60 = vmul.f32 %v7288_v58, %v7742_v9 }
 0x2fd   :  { %6923 = vmatprep.mubr.msk.f32.mxu1 %vm7492_vm0, %v7491_v0  ;;  %6926 = vmatprep.subr.mxu0 %v7491_v0  ;;  %v998_v61 = vmul.f32 %v7290_v59, %v7744_v10  ;;  %v1984_v7 = vpop.permute.xlu0 %1983 }
 0x2fe   :  { %6931 = vmatprep.subr.mxu1 %v7491_v0  ;;  %6924 = vmatmul.mubr.msk.f32.vlgmr.msra.gmra.mxu1 %vm317_vm2, %v999_v60 }
 0x2ff   :  { %6919 = vmatmul.mubr.msk.f32.vlgmr.msra.gmra.mxu0 %vm317_vm2, %v998_v61  ;;  %6932 = vmatpush3.xpose.msk.msra.mxu1 %vm317_vm2, %v1612_v25 }
 0x300   :  { %6927 = vmatpush3.msra.mxu0 %v7760_v16  ;;  %6933 = vmatprep.mubr.msk.f32.mxu1 %vm7492_vm0, %v7491_v0 }
 0x301   :  { %6941 = vmatprep.subr.mxu1 %v7491_v0  ;;  %6928 = vmatprep.mubr.msk.f32.mxu0 %vm7492_vm0, %v7491_v0  ;;  %v2132_v8 = vpop.permute.xlu0 %2131 }
 0x302   :  { %6934 = vmatmul.mubr.msk.f32.vlgmr.msra.gmra.mxu1 %vm317_vm2, %v1610_v62  ;;  %6936 = vmatprep.subr.mxu0 %v7491_v0 }
 0x303   :  { %6942 = vmatpush3.xpose.msk.msra.mxu1 %vm317_vm2, %v1762_v63  ;;  %6943 = vmatprep.mubr.msk.f32.mxu1 %vm7492_vm0, %v7491_v0 }
 0x304   :  { %6951 = vmatprep.subr.mxu1 %v7491_v0 }
 0x306   :  { %6944 = vmatmul.mubr.msk.f32.vlgmr.msra.gmra.mxu1 %vm317_vm2, %v1610_v62 }
 0x307   :  { %6953 = vmatprep.mubr.msk.f32.mxu1 %vm7492_vm0, %v7491_v0 }
 0x331   :  { %v984_v1 = vpop.xlane.xlu1 %983 }
 0x332   :  { %7291 = vrcp.f32 %v984_v1 }
 0x335   :  { %v1910_v2 = vpop.permute.xlu1 %1909 }
 0x336   :  { %6952 = vmatpush3.xpose.msk.msra.mxu1 %vm317_vm2, %v1910_v2 }
 0x337   :  { %6961 = vmatprep.subr.mxu1 %v7491_v0 }
 0x339   :  { %6954 = vmatmul.mubr.msk.f32.vlgmr.msra.gmra.mxu1 %vm317_vm2, %v1610_v62  ;;  %v2058_v3 = vpop.permute.xlu1 %2057 }
 0x33a   :  { %6962 = vmatpush3.xpose.msk.msra.mxu1 %vm317_vm2, %v2058_v3  ;;  %6963 = vmatprep.mubr.msk.f32.mxu1 %vm7492_vm0, %v7491_v0 }
 0x33b   :  { %6971 = vmatprep.subr.mxu1 %v7491_v0 }
 0x33d   :  { %6964 = vmatmul.mubr.msk.f32.vlgmr.msra.gmra.mxu1 %vm317_vm2, %v1610_v62 }
 0x33e   :  { %6973 = vmatprep.mubr.msk.f32.mxu1 %vm7492_vm0, %v7491_v0 }
 0x33f   :  { %v7292_v4 = vpop.eup %7291 }
 0x340   :  { %v1000_v5 = vmul.f32 %v7292_v4, %v7763_v20 }
 0x342   :  { %6929 = vmatmul.mubr.msk.f32.vlgmr.msra.gmra.mxu0 %vm317_vm2, %v1000_v5 }
 0x343   :  { %6937 = vmatpush3.xpose.msk.msra.mxu0 %vm317_vm2, %v7771_v26  ;;  %6938 = vmatprep.mubr.msk.f32.mxu0 %vm7492_vm0, %v7491_v0 }
 0x344   :  { %6946 = vmatprep.subr.mxu0 %v7491_v0 }
 0x346   :  { %6939 = vmatmul.mubr.msk.f32.vlgmr.msra.gmra.mxu0 %vm317_vm2, %v1610_v62 }
 0x347   :  { %6947 = vmatpush3.xpose.msk.msra.mxu0 %vm317_vm2, %v1836_v6  ;;  %6948 = vmatprep.mubr.msk.f32.mxu0 %vm7492_vm0, %v7491_v0 }
 0x348   :  { %6956 = vmatprep.subr.mxu0 %v7491_v0 }
 0x34a   :  { %6949 = vmatmul.mubr.msk.f32.vlgmr.msra.gmra.mxu0 %vm317_vm2, %v1610_v62 }
 0x34b   :  { %6957 = vmatpush3.xpose.msk.msra.mxu0 %vm317_vm2, %v1984_v7  ;;  %6958 = vmatprep.mubr.msk.f32.mxu0 %vm7492_vm0, %v7491_v0 }
 0x34c   :  { %6966 = vmatprep.subr.mxu0 %v7491_v0 }
 0x34e   :  { %6959 = vmatmul.mubr.msk.f32.vlgmr.msra.gmra.mxu0 %vm317_vm2, %v1610_v62 }
 0x34f   :  { %6967 = vmatpush3.xpose.msk.msra.mxu0 %vm317_vm2, %v2132_v8  ;;  %6968 = vmatprep.mubr.msk.f32.mxu0 %vm7492_vm0, %v7491_v0 }
 0x350   :  { %6976 = vmatprep.subr.mxu0 %v7491_v0 }
 0x352   :  { %6969 = vmatmul.mubr.msk.f32.vlgmr.msra.gmra.mxu0 %vm317_vm2, %v1610_v62 }
 0x353   :  { %6978 = vmatprep.mubr.msk.f32.mxu0 %vm7492_vm0, %v7491_v0 }
 0x3b1   :  { %v7850_v9 = vpop.f32.mrf.mxu1 }
 0x3b3   :  { %v6895_v10 = vpop.f32.mrf.mxu1 }
 0x3b5   :  { %v7852_v11 = vpop.f32.mrf.mxu0 }
 0x3b6   :  { %v7854_v12 = vpop.f32.mrf.mxu1 }
 0x3b7   :  { %v6900_v13 = vpop.f32.mrf.mxu0 }
 0x3b8   :  { %v6905_v14 = vpop.f32.mrf.mxu1 }
 0x3ba   :  { %v7856_v15 = vpop.f32.mrf.mxu1 }
 0x3bb   :  { %v7858_v16 = vpop.f32.mrf.mxu0 }
 0x3bc   :  { %v6915_v17 = vpop.f32.mrf.mxu1 }
 0x3bd   :  { %v6910_v18 = vpop.f32.mrf.mxu0 }
 0x3be   :  { %v7860_v19 = vpop.f32.mrf.mxu1 }
 0x3bf   :  { %v7862_v20 = vpop.f32.mrf.mxu0 }
 0x3c0   :  { %v6925_v21 = vpop.f32.mrf.mxu1 }
 0x3c1   :  { %v6920_v23 = vpop.f32.mrf.mxu0 }
 0x3c2   :  { %v1683_v24 = vpop.f32.mrf.mxu1 }
 0x3c3   :  { %v2205_v25 = vmul.f32 0.35355338, %v1683_v24 }
 0x3c4   :  { %v6935_v26 = vpop.f32.mrf.mxu1 }
 0x3c5   :  { %v2213_v22 = vsel %vm317_vm2, %v2205_v25, -inf }
 0x3c6   :  { %2214 = vmax.xlane.f32.xlu1 %v2213_v22  ;;  %v1831_v33 = vpop.f32.mrf.mxu1 }
 0x3c7   :  { %v2207_v57 = vmul.f32 0.35355338, %v1831_v33 }
 0x3c8   :  { %v6945_v34 = vpop.f32.mrf.mxu1 }
 0x3c9   :  { %v2219_v62 = vsel %vm317_vm2, %v2207_v57, -inf }
 0x3f9   :  { %v1979_v35 = vpop.f32.mrf.mxu1 }
 0x3fa   :  { %v2209_v36 = vmul.f32 0.35355338, %v1979_v35 }
 0x3fb   :  { %v6955_v38 = vpop.f32.mrf.mxu1 }
 0x3fc   :  { %v2225_v39 = vsel %vm317_vm2, %v2209_v36, -inf }
 0x3fd   :  { %2226 = vmax.xlane.f32.xlu1 %v2225_v39  ;;  %v2127_v42 = vpop.f32.mrf.mxu1 }
 0x3fe   :  { %v2211_v43 = vmul.f32 0.35355338, %v2127_v42 }
 0x3ff   :  { %v6965_v44 = vpop.f32.mrf.mxu1 }
 0x400   :  { %v2231_v46 = vsel %vm317_vm2, %v2211_v43, -inf }
 0x401   :  { %2232 = vmax.xlane.f32.xlu1 %v2231_v46 }
 0x402   :  { %v7867_v47 = vpop.f32.mrf.mxu0 }
 0x404   :  { %v6930_v50 = vpop.f32.mrf.mxu0 }
 0x406   :  { %v1757_v52 = vpop.f32.mrf.mxu0 }
 0x407   :  { %v2206_v55 = vmul.f32 0.35355338, %v1757_v52 }
 0x408   :  { %v6940_v56 = vpop.f32.mrf.mxu0 }
 0x409   :  { %v2216_v58 = vsel %vm317_vm2, %v2206_v55, -inf }
 0x40a   :  { %2217 = vmax.xlane.f32.xlu0 %v2216_v58  ;;  %v1905_v59 = vpop.f32.mrf.mxu0 }
 0x40b   :  { %v2208_v61 = vmul.f32 0.35355338, %v1905_v59 }
 0x40c   :  { %v6950_v60 = vpop.f32.mrf.mxu0 }
 0x40d   :  { %v2222_v3 = vsel %vm317_vm2, %v2208_v61, -inf }
 0x40e   :  { %2220 = vmax.xlane.f32.xlu0 %v2219_v62  ;;  %v2053_v63 = vpop.f32.mrf.mxu0 }
 0x40f   :  { %v2210_v2 = vmul.f32 0.35355338, %v2053_v63 }
 0x410   :  { %v6960_v1 = vpop.f32.mrf.mxu0 }
 0x411   :  { %v2228_v7 = vsel %vm317_vm2, %v2210_v2, -inf }
 0x412   :  { %2301 = vrot.lane.b32.xlu1 %v7636_v41, %s7495_s5  ;;  %2223 = vmax.xlane.f32.xlu0 %v2222_v3  ;;  %v2201_v4 = vpop.f32.mrf.mxu0 }
 0x413   :  { %v2212_v6 = vmul.f32 0.35355338, %v2201_v4 }
 0x414   :  { %v6970_v5 = vpop.f32.mrf.mxu0 }
 0x415   :  { %v2234_v8 = vsel %vm317_vm2, %v2212_v6, -inf }
 0x416   :  { %2453 = vrot.lane.b32.xlu1 %v7646_v45, %s7495_s5  ;;  %2229 = vmax.xlane.f32.xlu0 %v2228_v7 }
 0x41a   :  { %2529 = vrot.lane.b32.xlu1 %v7657_v48, %s7495_s5  ;;  %2235 = vmax.xlane.f32.xlu0 %v2234_v8 }
 0x41e   :  { %2605 = vrot.lane.b32.xlu1 %v7659_v49, %s7495_s5 }
 0x430   :  { %2377 = vrot.lane.b32.xlu0 %v7632_v37, %s7495_s5 }
 0x434   :  { %2681 = vrot.lane.b32.xlu0 %v7663_v51, %s7495_s5 }
 0x44f   :  { %v2215_v10 = vpop.xlane.xlu1 %2214 }
 0x450   :  { %v2237_v13 = vsub.f32 %v2205_v25, %v2215_v10 }
 0x452   :  { %v2245_v14 = vmul.f32 1.442695, %v2237_v13 }
 0x454   :  { %7293 = vpow2.f32 %v2245_v14 }
 0x461   :  { %v7886_v17 = vpop.eup %7293 }
 0x462   :  { %v2261_v18 = vsel %vm317_vm2, %v7886_v17, 0.0 }
 0x463   :  { %2262 = vadd.xlane.f32.xlu1 %v2261_v18 }
 0x486   :  { %v2227_v21 = vpop.xlane.xlu1 %2226 }
 0x487   :  { %v2241_v33 = vsub.f32 %v2209_v36, %v2227_v21 }
 0x489   :  { %v2253_v38 = vmul.f32 1.442695, %v2241_v33 }
 0x48a   :  { %v2233_v23 = vpop.xlane.xlu1 %2232 }
 0x48b   :  { %v2243_v39 = vsub.f32 %v2211_v43, %v2233_v23 }
 0x48d   :  { %v2257_v50 = vmul.f32 1.442695, %v2243_v39 }
 0x48e   :  { %v2302_v24 = vpop.permute.xlu1 %2301 }
 0x48f   :  { %6972 = vmatpush3.msra.mxu1 %v2302_v24 }
 0x490   :  { %6981 = vmatprep.subr.mxu1 %v7491_v0 }
 0x492   :  { %v2454_v14 = vpop.permute.xlu1 %2453 }
 0x493   :  { %v2218_v26 = vpop.xlane.xlu0 %2217 }
 0x494   :  { %v2238_v22 = vsub.f32 %v2206_v55, %v2218_v26 }
 0x496   :  { %v2247_v34 = vmul.f32 1.442695, %v2238_v22  ;;  %v2530_v18 = vpop.permute.xlu1 %2529 }
 0x497   :  { %v2221_v35 = vpop.xlane.xlu0 %2220 }
 0x498   :  { %7295 = vpow2.f32 %v2247_v34  ;;  %v2239_v25 = vsub.f32 %v2207_v57, %v2221_v35 }
 0x49a   :  { %v2249_v42 = vmul.f32 1.442695, %v2239_v25  ;;  %v2606_v21 = vpop.permute.xlu1 %2605 }
 0x49b   :  { %v2224_v44 = vpop.xlane.xlu0 %2223 }
 0x49c   :  { %7297 = vpow2.f32 %v2249_v42  ;;  %v2240_v46 = vsub.f32 %v2208_v61, %v2224_v44 }
 0x49d   :  { %7299 = vpow2.f32 %v2253_v38 }
 0x49e   :  { %v2251_v52 = vmul.f32 1.442695, %v2240_v46 }
 0x49f   :  { %v2230_v56 = vpop.xlane.xlu0 %2229 }
 0x4a0   :  { %7301 = vpow2.f32 %v2251_v52  ;;  %v2242_v58 = vsub.f32 %v2210_v2, %v2230_v56 }
 0x4a1   :  { %7303 = vpow2.f32 %v2257_v50 }
 0x4a2   :  { %v2255_v59 = vmul.f32 1.442695, %v2242_v58 }
 0x4a3   :  { %v2236_v55 = vpop.xlane.xlu0 %2235 }
 0x4a4   :  { %7305 = vpow2.f32 %v2255_v59  ;;  %v2244_v36 = vsub.f32 %v2212_v6, %v2236_v55 }
 0x4a5   :  { %v7891_v60 = vpop.eup %7295 }
 0x4a6   :  { %v2259_v57 = vmul.f32 1.442695, %v2244_v36  ;;  %v2264_v43 = vsel %vm317_vm2, %v7891_v60, 0.0 }
 0x4a7   :  { %2265 = vadd.xlane.f32.xlu0 %v2264_v43  ;;  %v2378_v62 = vpop.permute.xlu0 %2377 }
 0x4a8   :  { %7307 = vpow2.f32 %v2259_v57  ;;  %6977 = vmatpush3.msra.mxu0 %v2378_v62 }
 0x4a9   :  { %v7895_v61 = vpop.eup %7297  ;;  %6986 = vmatprep.subr.mxu0 %v7491_v0 }
 0x4aa   :  { %v2267_v63 = vsel %vm317_vm2, %v7895_v61, 0.0  ;;  %v7900_v1 = vpop.eup %7299 }
 0x4ab   :  { %2268 = vadd.xlane.f32.xlu1 %v2267_v63  ;;  %v2273_v3 = vsel %vm317_vm2, %v7900_v1, 0.0  ;;  %v2682_v22 = vpop.permute.xlu0 %2681 }
 0x4ad   :  { %v7902_v2 = vpop.eup %7301 }
 0x4ae   :  { %v2270_v4 = vsel %vm317_vm2, %v7902_v2, 0.0  ;;  %v7908_v5 = vpop.eup %7303 }
 0x4af   :  { %2274 = vadd.xlane.f32.xlu1 %v2273_v3  ;;  %2271 = vadd.xlane.f32.xlu0 %v2270_v4  ;;  %v2279_v7 = vsel %vm317_vm2, %v7908_v5, 0.0 }
 0x4b1   :  { %v7910_v6 = vpop.eup %7305 }
 0x4b2   :  { %v2276_v8 = vsel %vm317_vm2, %v7910_v6, 0.0 }
 0x4b3   :  { %2280 = vadd.xlane.f32.xlu1 %v2279_v7  ;;  %2277 = vadd.xlane.f32.xlu0 %v2276_v8 }
 0x4b5   :  { %v7916_v10 = vpop.eup %7307 }
 0x4b6   :  { %v2282_v13 = vsel %vm317_vm2, %v7916_v10, 0.0 }
 0x4b7   :  { %2283 = vadd.xlane.f32.xlu0 %v2282_v13 }
 0x4c4   :  { %2757 = vrot.lane.b32.xlu1 %v7672_v53, %s7495_s5 }
 0x4c8   :  { %3169 = vrot.lane.b32.xlu1 %v7636_v41, %s7496_s23 }
 0x4cc   :  { %3167 = vrot.lane.b32.xlu1 %v7634_v40, %s7496_s23 }
 0x4cd   :  { %2833 = vrot.lane.b32.xlu0 %v7679_v54, %s7495_s5 }
 0x4d0   :  { %3393 = vrot.lane.b32.xlu1 %v7657_v48, %s7496_s23 }
 0x4d1   :  { %3245 = vrot.lane.b32.xlu0 %v7632_v37, %s7496_s23 }
 0x4d4   :  { %3541 = vrot.lane.b32.xlu1 %v7663_v51, %s7496_s23 }
 0x4d5   :  { %3319 = vrot.lane.b32.xlu0 %v7646_v45, %s7496_s23 }
 0x4d8   :  { %3689 = vrot.lane.b32.xlu1 %v7679_v54, %s7496_s23 }
 0x4d9   :  { %3467 = vrot.lane.b32.xlu0 %v7659_v49, %s7496_s23 }
 0x4dd   :  { %3615 = vrot.lane.b32.xlu0 %v7672_v53, %s7496_s23 }
 0x4ec   :  { %v2263_v23 = vpop.xlane.xlu1 %2262 }
 0x4ed   :  { %7309 = vrcp.f32 %v2263_v23 }
 0x4fa   :  { %v7310_v24 = vpop.eup %7309 }
 0x4fb   :  { %v2293_v26 = vmul.f32 %v7310_v24, %v7886_v17 }
 0x4fd   :  { %6974 = vmatmul.mubr.msk.f32.vlgmr.msra.gmra.mxu1 %vm317_vm2, %v2293_v26 }
 0x4fe   :  { %6982 = vmatpush3.msra.mxu1 %v2454_v14  ;;  %6983 = vmatprep.mubr.msk.f32.mxu1 %vm7492_vm0, %v7491_v0 }
 0x4ff   :  { %6991 = vmatprep.subr.mxu1 %v7491_v0 }
 0x530   :  { %v2266_v33 = vpop.xlane.xlu0 %2265 }
 0x531   :  { %7311 = vrcp.f32 %v2266_v33 }
 0x534   :  { %v2269_v34 = vpop.xlane.xlu1 %2268 }
 0x535   :  { %7313 = vrcp.f32 %v2269_v34 }
 0x538   :  { %v2275_v35 = vpop.xlane.xlu1 %2274  ;;  %v2272_v25 = vpop.xlane.xlu0 %2271 }
 0x539   :  { %7315 = vrcp.f32 %v2275_v35 }
 0x53a   :  { %7317 = vrcp.f32 %v2272_v25 }
 0x53c   :  { %v2281_v38 = vpop.xlane.xlu1 %2280  ;;  %v2278_v39 = vpop.xlane.xlu0 %2277 }
 0x53d   :  { %7319 = vrcp.f32 %v2281_v38 }
 0x53e   :  { %v7312_v17 = vpop.eup %7311  ;;  %7321 = vrcp.f32 %v2278_v39 }
 0x53f   :  { %v2294_v42 = vmul.f32 %v7312_v17, %v7891_v60  ;;  %v87_v60 = vld [vmem:[#allocation4 + $0x8] sm:$0xff] }
 0x540   :  { %v2284_v44 = vpop.xlane.xlu0 %2283  ;;  %v2758_v55 = vpop.permute.xlu1 %2757 }
 0x541   :  { %7323 = vrcp.f32 %v2284_v44  ;;  %6979 = vmatmul.mubr.msk.f32.vlgmr.msra.gmra.mxu0 %vm317_vm2, %v2294_v42 }
 0x542   :  { %v7314_v46 = vpop.eup %7313  ;;  %6987 = vmatpush3.msra.mxu0 %v2530_v18  ;;  %6988 = vmatprep.mubr.msk.f32.mxu0 %vm7492_vm0, %v7491_v0 }
 0x543   :  { %v2295_v50 = vmul.f32 %v7314_v46, %v7895_v61  ;;  %6996 = vmatprep.subr.mxu0 %v7491_v0  ;;  %v86_v61 = vld [vmem:[#allocation4] sm:$0xff] }
 0x544   :  { %v3170_v3 = vpop.permute.xlu1 %3169 }
 0x545   :  { %6984 = vmatmul.mubr.msk.f32.vlgmr.msra.gmra.mxu1 %vm317_vm2, %v2295_v50 }
 0x546   :  { %v7316_v52 = vpop.eup %7315  ;;  %6992 = vmatpush3.msra.mxu1 %v2606_v21  ;;  %6993 = vmatprep.mubr.msk.f32.mxu1 %vm7492_vm0, %v7491_v0 }
 0x547   :  { %v7318_v56 = vpop.eup %7317  ;;  %7001 = vmatprep.subr.mxu1 %v7491_v0  ;;  %v2297_v58 = vmul.f32 %v7316_v52, %v7900_v1  ;;  %v2834_v1 = vpop.permute.xlu0 %2833 }
 0x548   :  { %v2296_v59 = vmul.f32 %v7318_v56, %v7902_v2 }
 0x549   :  { %6994 = vmatmul.mubr.msk.f32.vlgmr.msra.gmra.mxu1 %vm317_vm2, %v2297_v58 }
 0x54a   :  { %v7320_v36 = vpop.eup %7319  ;;  %6989 = vmatmul.mubr.msk.f32.vlgmr.msra.gmra.mxu0 %vm317_vm2, %v2296_v59  ;;  %7002 = vmatpush3.msra.mxu1 %v2758_v55 }
 0x54b   :  { %v7322_v57 = vpop.eup %7321  ;;  %6997 = vmatpush3.msra.mxu0 %v2682_v22  ;;  %7003 = vmatprep.mubr.msk.f32.mxu1 %vm7492_vm0, %v7491_v0  ;;  %v2299_v43 = vmul.f32 %v7320_v36, %v7908_v5  ;;  %v3246_v4 = vpop.permute.xlu0 %3245 }
 0x54c   :  { %6998 = vmatprep.mubr.msk.f32.mxu0 %vm7492_vm0, %v7491_v0  ;;  %7006 = vmatprep.subr.mxu0 %v7491_v0  ;;  %v2298_v62 = vmul.f32 %v7322_v57, %v7910_v6 }
 0x54d   :  { %7004 = vmatmul.mubr.msk.f32.vlgmr.msra.gmra.mxu1 %vm317_vm2, %v2299_v43  ;;  %7011 = vmatprep.subr.mxu1 %v87_v60 }
 0x54e   :  { %v7324_v63 = vpop.eup %7323  ;;  %6999 = vmatmul.mubr.msk.f32.vlgmr.msra.gmra.mxu0 %vm317_vm2, %v2298_v62  ;;  %7012 = vmatpush3.msra.mxu1 %v87_v60 }
 0x54f   :  { %7007 = vmatpush3.msra.mxu0 %v2834_v1  ;;  %7008 = vmatprep.mubr.msk.f32.mxu0 %vm7492_vm0, %v7491_v0  ;;  %v2300_v2 = vmul.f32 %v7324_v63, %v7916_v10  ;;  %v3320_v26 = vpop.permute.xlu0 %3319 }
 0x550   :  { %7025 = vmatprep.subr.mxu0 %v86_v61  ;;  %7039 = vmatprep.subr.mxu1 %v7491_v0 }
 0x552   :  { %7009 = vmatmul.mubr.msk.f32.vlgmr.msra.gmra.mxu0 %vm317_vm2, %v2300_v2 }
 0x553   :  { %7027 = vmatprep.mubr.msk.f32.mxu0 %vm317_vm2, %v7850_v9  ;;  %7026 = vmatpush3.msra.mxu0 %v86_v61  ;;  %v7979_v9 = vpop.permute.xlu1 %3167  ;;  %v3468_v35 = vpop.permute.xlu0 %3467 }
 0x554   :  { %7044 = vmatprep.subr.mxu0 %v7491_v0 }
 0x556   :  { %7028 = vmatmul.mubr.msk.f32.vlgmr.msra.gmra.mxu0 %vm317_vm2, %v7852_v11 }
 0x557   :  { %7045 = vmatpush3.xpose.msk.msra.mxu0 %vm317_vm2, %v3246_v4  ;;  %7030 = vmatprep.mubr.msk.f32.mxu0 %vm317_vm2, %v7854_v12  ;;  %v3394_v11 = vpop.permute.xlu1 %3393  ;;  %v3616_v17 = vpop.permute.xlu0 %3615 }
 0x558   :  { %7054 = vmatprep.subr.mxu0 %v7491_v0 }
 0x55a   :  { %7031 = vmatmul.mubr.msk.f32.gmra.mxu0 %vm317_vm2, %v7858_v16 }
 0x55b   :  { %7033 = vmatprep.mubr.msk.f32.mxu0 %vm317_vm2, %v7856_v15  ;;  %v3542_v12 = vpop.permute.xlu1 %3541 }
 0x55e   :  { %7034 = vmatmul.mubr.msk.f32.gmra.mxu0 %vm317_vm2, %v7862_v20 }
 0x55f   :  { %7036 = vmatprep.mubr.msk.f32.mxu0 %vm317_vm2, %v7860_v19  ;;  %v3690_v15 = vpop.permute.xlu1 %3689 }
 0x562   :  { %7037 = vmatmul.mubr.msk.f32.gmra.mxu0 %vm317_vm2, %v7867_v47 }
 0x563   :  { %7046 = vmatprep.mubr.msk.f32.mxu0 %vm7492_vm0, %v7491_v0 }
 0x566   :  { %7047 = vmatmul.mubr.msk.f32.vlgmr.msra.gmra.mxu0 %vm317_vm2, %v7979_v9 }
 0x567   :  { %7055 = vmatpush3.xpose.msk.msra.mxu0 %vm317_vm2, %v3394_v11  ;;  %7056 = vmatprep.mubr.msk.f32.mxu0 %vm7492_vm0, %v7491_v0 }
 0x568   :  { %7064 = vmatprep.subr.mxu0 %v7491_v0 }
 0x56a   :  { %7057 = vmatmul.mubr.msk.f32.vlgmr.msra.gmra.mxu0 %vm317_vm2, %v7979_v9 }
 0x56b   :  { %7065 = vmatpush3.xpose.msk.msra.mxu0 %vm317_vm2, %v3542_v12  ;;  %7066 = vmatprep.mubr.msk.f32.mxu0 %vm7492_vm0, %v7491_v0 }
 0x56c   :  { %7074 = vmatprep.subr.mxu0 %v7491_v0 }
 0x56e   :  { %7067 = vmatmul.mubr.msk.f32.vlgmr.msra.gmra.mxu0 %vm317_vm2, %v7979_v9 }
 0x56f   :  { %7075 = vmatpush3.xpose.msk.msra.mxu0 %vm317_vm2, %v3690_v15  ;;  %7076 = vmatprep.mubr.msk.f32.mxu0 %vm7492_vm0, %v7491_v0 }
 0x570   :  { %7084 = vmatprep.subr.mxu0 %v7491_v0 }
 0x572   :  { %7077 = vmatmul.mubr.msk.f32.vlgmr.msra.gmra.mxu0 %vm317_vm2, %v7979_v9 }
 0x573   :  { %7086 = vmatprep.mubr.msk.f32.mxu0 %vm7492_vm0, %v7491_v0 }
 0x5bd   :  { %v2373_v16 = vpop.f32.mrf.mxu1 }
 0x5be   :  { %7013 = vmatprep.mubr.msk.f32.mxu1 %vm317_vm2, %v2373_v16 }
 0x5bf   :  { %v6975_v19 = vpop.f32.mrf.mxu1 }
 0x601   :  { %v2449_v20 = vpop.f32.mrf.mxu0 }
 0x602   :  { %7014 = vmatmul.mubr.msk.f32.vlgmr.msra.gmra.mxu1 %vm317_vm2, %v2449_v20 }
 0x603   :  { %7040 = vmatpush3.xpose.msk.msra.mxu1 %vm317_vm2, %v3170_v3  ;;  %v6980_v47 = vpop.f32.mrf.mxu0 }
 0x604   :  { %7049 = vmatprep.subr.mxu1 %v7491_v0 }
 0x605   :  { %v2525_v5 = vpop.f32.mrf.mxu1 }
 0x606   :  { %7016 = vmatprep.mubr.msk.f32.mxu1 %vm317_vm2, %v2525_v5 }
 0x607   :  { %v6985_v6 = vpop.f32.mrf.mxu1 }
 0x609   :  { %v2677_v7 = vpop.f32.mrf.mxu1 }
 0x60a   :  { %v2601_v8 = vpop.f32.mrf.mxu0 }
 0x60b   :  { %7017 = vmatmul.mubr.msk.f32.gmra.mxu1 %vm317_vm2, %v2601_v8  ;;  %v6995_v10 = vpop.f32.mrf.mxu1 }
 0x60c   :  { %v6990_v13 = vpop.f32.mrf.mxu0  ;;  %7019 = vmatprep.mubr.msk.f32.mxu1 %vm317_vm2, %v2677_v7 }
 0x60d   :  { %v2829_v14 = vpop.f32.mrf.mxu1 }
 0x60e   :  { %v2753_v18 = vpop.f32.mrf.mxu0 }
 0x60f   :  { %7020 = vmatmul.mubr.msk.f32.gmra.mxu1 %vm317_vm2, %v2753_v18  ;;  %v7005_v21 = vpop.f32.mrf.mxu1 }
 0x610   :  { %v7000_v23 = vpop.f32.mrf.mxu0  ;;  %7022 = vmatprep.mubr.msk.f32.mxu1 %vm317_vm2, %v2829_v14 }
 0x612   :  { %v2905_v24 = vpop.f32.mrf.mxu0 }
 0x613   :  { %7023 = vmatmul.mubr.msk.f32.gmra.mxu1 %vm317_vm2, %v2905_v24 }
 0x614   :  { %v7010_v22 = vpop.f32.mrf.mxu0  ;;  %7041 = vmatprep.mubr.msk.f32.mxu1 %vm7492_vm0, %v7491_v0 }
 0x616   :  { %v8023_v33 = vpop.f32.mrf.mxu0 }
 0x617   :  { %7042 = vmatmul.mubr.msk.f32.vlgmr.msra.gmra.mxu1 %vm317_vm2, %v7979_v9 }
 0x618   :  { %7050 = vmatpush3.xpose.msk.msra.mxu1 %vm317_vm2, %v3320_v26  ;;  %v8028_v34 = vpop.f32.mrf.mxu0  ;;  %7051 = vmatprep.mubr.msk.f32.mxu1 %vm7492_vm0, %v7491_v0 }
 0x619   :  { %7059 = vmatprep.subr.mxu1 %v7491_v0 }
 0x61a   :  { %v8033_v25 = vpop.f32.mrf.mxu0 }
 0x61b   :  { %7052 = vmatmul.mubr.msk.f32.vlgmr.msra.gmra.mxu1 %vm317_vm2, %v7979_v9 }
 0x61c   :  { %7060 = vmatpush3.xpose.msk.msra.mxu1 %vm317_vm2, %v3468_v35  ;;  %v8038_v38 = vpop.f32.mrf.mxu0  ;;  %7061 = vmatprep.mubr.msk.f32.mxu1 %vm7492_vm0, %v7491_v0 }
 0x61d   :  { %7069 = vmatprep.subr.mxu1 %v7491_v0 }
 0x61e   :  { %v8043_v39 = vpop.f32.mrf.mxu0 }
 0x61f   :  { %7062 = vmatmul.mubr.msk.f32.vlgmr.msra.gmra.mxu1 %vm317_vm2, %v7979_v9 }
 0x620   :  { %7070 = vmatpush3.xpose.msk.msra.mxu1 %vm317_vm2, %v3616_v17  ;;  %v8048_v42 = vpop.f32.mrf.mxu0  ;;  %7071 = vmatprep.mubr.msk.f32.mxu1 %vm7492_vm0, %v7491_v0 }
 0x621   :  { %7079 = vmatprep.subr.mxu1 %v7491_v0 }
 0x622   :  { %v8053_v44 = vpop.f32.mrf.mxu0 }
 0x623   :  { %7072 = vmatmul.mubr.msk.f32.vlgmr.msra.gmra.mxu1 %vm317_vm2, %v7979_v9 }
 0x624   :  { %v8057_v46 = vpop.f32.mrf.mxu0  ;;  %7081 = vmatprep.mubr.msk.f32.mxu1 %vm7492_vm0, %v7491_v0 }
 0x626   :  { %v3315_v50 = vpop.f32.mrf.mxu0 }
 0x627   :  { %v3764_v52 = vmul.f32 0.35355338, %v3315_v50 }
 0x628   :  { %v7048_v56 = vpop.f32.mrf.mxu0 }
 0x629   :  { %v3774_v58 = vsel %vm317_vm2, %v3764_v52, -inf }
 0x62a   :  { %3775 = vmax.xlane.f32.xlu1 %v3774_v58  ;;  %v3463_v59 = vpop.f32.mrf.mxu0 }
 0x62b   :  { %v3766_v55 = vmul.f32 0.35355338, %v3463_v59 }
 0x62c   :  { %v7058_v36 = vpop.f32.mrf.mxu0 }
 0x62d   :  { %v3780_v60 = vsel %vm317_vm2, %v3766_v55, -inf }
 0x62e   :  { %3781 = vmax.xlane.f32.xlu0 %v3780_v60  ;;  %v3611_v57 = vpop.f32.mrf.mxu0 }
 0x62f   :  { %v3768_v43 = vmul.f32 0.35355338, %v3611_v57 }
 0x630   :  { %v7068_v62 = vpop.f32.mrf.mxu0 }
 0x631   :  { %v3786_v61 = vsel %vm317_vm2, %v3768_v43, -inf }
 0x632   :  { %3787 = vmax.xlane.f32.xlu1 %v3786_v61  ;;  %v3759_v63 = vpop.f32.mrf.mxu0 }
 0x633   :  { %v3770_v1 = vmul.f32 0.35355338, %v3759_v63 }
 0x634   :  { %v7078_v2 = vpop.f32.mrf.mxu0 }
 0x635   :  { %v3792_v3 = vsel %vm317_vm2, %v3770_v1, -inf }
 0x636   :  { %3793 = vmax.xlane.f32.xlu1 %v3792_v3 }
 0x6b3   :  { %v3776_v4 = vpop.xlane.xlu1 %3775 }
 0x6b4   :  { %v3796_v9 = vsub.f32 %v3764_v52, %v3776_v4 }
 0x6b6   :  { %v3805_v11 = vmul.f32 1.442695, %v3796_v9 }
 0x6b7   :  { %v3782_v12 = vpop.xlane.xlu0 %3781 }
 0x6b8   :  { %7325 = vpow2.f32 %v3805_v11  ;;  %v3798_v15 = vsub.f32 %v3766_v55, %v3782_v12 }
 0x6ba   :  { %v3809_v16 = vmul.f32 1.442695, %v3798_v15 }
 0x6bb   :  { %v3788_v19 = vpop.xlane.xlu1 %3787 }
 0x6bc   :  { %7327 = vpow2.f32 %v3809_v16  ;;  %v3800_v20 = vsub.f32 %v3768_v43, %v3788_v19 }
 0x6be   :  { %v3813_v47 = vmul.f32 1.442695, %v3800_v20 }
 0x6bf   :  { %v3794_v5 = vpop.xlane.xlu1 %3793 }
 0x6c0   :  { %7329 = vpow2.f32 %v3813_v47  ;;  %v3802_v6 = vsub.f32 %v3770_v1, %v3794_v5 }
 0x6c2   :  { %v3817_v7 = vmul.f32 1.442695, %v3802_v6  ;;  %v8065_v10 = vpop.f32.mrf.mxu1 }
 0x6c4   :  { %7331 = vpow2.f32 %v3817_v7  ;;  %v8070_v18 = vpop.f32.mrf.mxu1 }
 0x6c5   :  { %v7326_v8 = vpop.eup %7325 }
 0x6c6   :  { %v3822_v13 = vsel %vm317_vm2, %v7326_v8, 0.0 }
 0x6c7   :  { %3823 = vadd.xlane.f32.xlu1 %v3822_v13 }
 0x6c9   :  { %v8068_v14 = vpop.eup %7327 }
 0x6ca   :  { %v3828_v21 = vsel %vm317_vm2, %v8068_v14, 0.0 }
 0x6cb   :  { %v8074_v23 = vpop.f32.mrf.mxu1  ;;  %3829 = vadd.xlane.f32.xlu1 %v3828_v21 }
 0x6cd   :  { %v8076_v24 = vpop.eup %7329  ;;  %v8078_v26 = vpop.f32.mrf.mxu1 }
 0x6ce   :  { %v3834_v22 = vsel %vm317_vm2, %v8076_v24, 0.0 }
 0x6cf   :  { %v8082_v35 = vpop.f32.mrf.mxu1  ;;  %3835 = vadd.xlane.f32.xlu1 %v3834_v22 }
 0x6d1   :  { %v8084_v17 = vpop.eup %7331  ;;  %v8086_v50 = vpop.f32.mrf.mxu1 }
 0x6d2   :  { %v3840_v52 = vsel %vm317_vm2, %v8084_v17, 0.0 }
 0x6d3   :  { %v8090_v56 = vpop.f32.mrf.mxu1  ;;  %3841 = vadd.xlane.f32.xlu1 %v3840_v52 }
 0x6d5   :  { %v8092_v58 = vpop.f32.mrf.mxu1 }
 0x6d7   :  { %v3241_v59 = vpop.f32.mrf.mxu1 }
 0x6d8   :  { %v3763_v55 = vmul.f32 0.35355338, %v3241_v59 }
 0x6d9   :  { %v7043_v36 = vpop.f32.mrf.mxu1 }
 0x6da   :  { %v3771_v60 = vsel %vm317_vm2, %v3763_v55, -inf }
 0x6db   :  { %v3389_v57 = vpop.f32.mrf.mxu1  ;;  %3772 = vmax.xlane.f32.xlu0 %v3771_v60 }
 0x6dc   :  { %v3765_v43 = vmul.f32 0.35355338, %v3389_v57 }
 0x6dd   :  { %v7053_v62 = vpop.f32.mrf.mxu1 }
 0x6de   :  { %v3777_v61 = vsel %vm317_vm2, %v3765_v43, -inf }
 0x6df   :  { %v3537_v63 = vpop.f32.mrf.mxu1  ;;  %3778 = vmax.xlane.f32.xlu0 %v3777_v61 }
 0x6e0   :  { %v3767_v1 = vmul.f32 0.35355338, %v3537_v63 }
 0x6e1   :  { %v7063_v2 = vpop.f32.mrf.mxu1 }
 0x6e2   :  { %v3783_v3 = vsel %vm317_vm2, %v3767_v1, -inf }
 0x6e3   :  { %v3685_v4 = vpop.f32.mrf.mxu1  ;;  %3784 = vmax.xlane.f32.xlu0 %v3783_v3 }
 0x6e4   :  { %v8097_v9 = vmul.f32 0.35355338, %v3685_v4  ;;  %3935 = vrot.lane.b32.xlu1 %v7632_v37, %s7497_s24 }
 0x6e5   :  { %v7073_v11 = vpop.f32.mrf.mxu1 }
 0x6e6   :  { %v3789_v12 = vsel %vm317_vm2, %v8097_v9, -inf }
 0x6e7   :  { %3790 = vmax.xlane.f32.xlu0 %v3789_v12 }
 0x6e8   :  { %4011 = vrot.lane.b32.xlu1 %v7646_v45, %s7497_s24 }
 0x6ec   :  { %4087 = vrot.lane.b32.xlu1 %v7657_v48, %s7497_s24 }
 0x6f0   :  { %4239 = vrot.lane.b32.xlu1 %v7663_v51, %s7497_s24 }
 0x6f4   :  { %4391 = vrot.lane.b32.xlu1 %v7679_v54, %s7497_s24 }
 0x6f8   :  { %4604 = vrot.lane.b32.xlu1 %v7634_v40, %s7498_s25 }
 0x6fc   :  { %4756 = vrot.lane.b32.xlu1 %v7646_v45, %s7498_s25 }
 0x6fd   :  { %3859 = vrot.lane.b32.xlu0 %v7636_v41, %s7497_s24 }
 0x700   :  { %4904 = vrot.lane.b32.xlu1 %v7659_v49, %s7498_s25 }
 0x701   :  { %4163 = vrot.lane.b32.xlu0 %v7659_v49, %s7497_s24 }
 0x704   :  { %5052 = vrot.lane.b32.xlu1 %v7672_v53, %s7498_s25 }
 0x750   :  { %v3824_v15 = vpop.xlane.xlu1 %3823 }
 0x751   :  { %7333 = vrcp.f32 %v3824_v15 }
 0x754   :  { %v3830_v16 = vpop.xlane.xlu1 %3829 }
 0x755   :  { %7335 = vrcp.f32 %v3830_v16 }
 0x758   :  { %v3836_v40 = vpop.xlane.xlu1 %3835 }
 0x759   :  { %7337 = vrcp.f32 %v3836_v40 }
 0x75c   :  { %v3842_v19 = vpop.xlane.xlu1 %3841 }
 0x75d   :  { %7339 = vrcp.f32 %v3842_v19 }
 0x75e   :  { %v7334_v20 = vpop.eup %7333 }
 0x75f   :  { %v3852_v47 = vmul.f32 %v7334_v20, %v7326_v8 }
 0x760   :  { %v3936_v5 = vpop.permute.xlu1 %3935 }
 0x761   :  { %7085 = vmatpush3.msra.mxu0 %v3936_v5 }
 0x762   :  { %7087 = vmatmul.mubr.msk.f32.vlgmr.msra.gmra.mxu0 %vm317_vm2, %v3852_v47  ;;  %7094 = vmatprep.subr.mxu0 %v7491_v0  ;;  %v7336_v13 = vpop.eup %7335 }
 0x763   :  { %7096 = vmatprep.mubr.msk.f32.mxu0 %vm7492_vm0, %v7491_v0  ;;  %v3854_v8 = vmul.f32 %v7336_v13, %v8068_v14 }
 0x764   :  { %v3773_v6 = vpop.xlane.xlu0 %3772  ;;  %v8127_v7 = vpop.permute.xlu1 %4011 }
 0x765   :  { %v3795_v21 = vsub.f32 %v3763_v55, %v3773_v6 }
 0x766   :  { %v7338_v36 = vpop.eup %7337 }
 0x767   :  { %v3803_v22 = vmul.f32 1.442695, %v3795_v21  ;;  %v3856_v55 = vmul.f32 %v7338_v36, %v8076_v24 }
 0x768   :  { %v3779_v52 = vpop.xlane.xlu0 %3778  ;;  %v4088_v59 = vpop.permute.xlu1 %4087 }
 0x769   :  { %7341 = vpow2.f32 %v3803_v22  ;;  %v3797_v60 = vsub.f32 %v3765_v43, %v3779_v52  ;;  %7095 = vmatpush3.msra.mxu0 %v4088_v59 }
 0x76a   :  { %7097 = vmatmul.mubr.msk.f32.vlgmr.msra.gmra.mxu0 %vm317_vm2, %v3854_v8  ;;  %7104 = vmatprep.subr.mxu0 %v7491_v0  ;;  %v7340_v63 = vpop.eup %7339 }
 0x76b   :  { %v3807_v57 = vmul.f32 1.442695, %v3797_v60  ;;  %7106 = vmatprep.mubr.msk.f32.mxu0 %vm7492_vm0, %v7491_v0  ;;  %v3858_v4 = vmul.f32 %v7340_v63, %v8084_v17 }
 0x76c   :  { %v3785_v62 = vpop.xlane.xlu0 %3784  ;;  %v4240_v61 = vpop.permute.xlu1 %4239 }
 0x76d   :  { %7343 = vpow2.f32 %v3807_v57  ;;  %v3799_v2 = vsub.f32 %v3767_v1, %v3785_v62  ;;  %7105 = vmatpush3.msra.mxu0 %v4240_v61 }
 0x76e   :  { %7107 = vmatmul.mubr.msk.f32.vlgmr.msra.gmra.mxu0 %vm317_vm2, %v3856_v55  ;;  %7114 = vmatprep.subr.mxu0 %v7491_v0  ;;  %v88_v55 = vld [vmem:[#allocation4 + $0x10] sm:$0xff] }
 0x76f   :  { %v3811_v14 = vmul.f32 1.442695, %v3799_v2  ;;  %7116 = vmatprep.mubr.msk.f32.mxu0 %vm7492_vm0, %v7491_v0 }
 0x770   :  { %v3791_v43 = vpop.xlane.xlu0 %3790  ;;  %v4392_v3 = vpop.permute.xlu1 %4391 }
 0x771   :  { %7345 = vpow2.f32 %v3811_v14  ;;  %v3801_v11 = vsub.f32 %v8097_v9, %v3791_v43  ;;  %7115 = vmatpush3.msra.mxu0 %v4392_v3 }
 0x772   :  { %7117 = vmatmul.mubr.msk.f32.vlgmr.msra.gmra.mxu0 %vm317_vm2, %v3858_v4  ;;  %7133 = vmatprep.subr.mxu0 %v7491_v0 }
 0x773   :  { %v3815_v24 = vmul.f32 1.442695, %v3801_v11  ;;  %7135 = vmatprep.mubr.msk.f32.mxu0 %vm7492_vm0, %v7491_v0 }
 0x774   :  { %v3860_v1 = vpop.permute.xlu0 %3859  ;;  %v8169_v62 = vpop.permute.xlu1 %4604 }
 0x775   :  { %7347 = vpow2.f32 %v3815_v24  ;;  %7080 = vmatpush3.msra.mxu1 %v3860_v1 }
 0x776   :  { %v7342_v12 = vpop.eup %7341  ;;  %7089 = vmatprep.subr.mxu1 %v7491_v0 }
 0x777   :  { %v3819_v17 = vsel %vm317_vm2, %v7342_v12, 0.0 }
 0x778   :  { %3820 = vadd.xlane.f32.xlu0 %v3819_v17  ;;  %v4164_v47 = vpop.permute.xlu0 %4163  ;;  %v4757_v14 = vpop.permute.xlu1 %4756 }
 0x77a   :  { %v7344_v15 = vpop.eup %7343 }
 0x77b   :  { %v3825_v9 = vsel %vm317_vm2, %v7344_v15, 0.0 }
 0x77c   :  { %3826 = vadd.xlane.f32.xlu0 %v3825_v9 }
 0x77e   :  { %v7346_v16 = vpop.eup %7345 }
 0x77f   :  { %v3831_v40 = vsel %vm317_vm2, %v7346_v16, 0.0 }
 0x780   :  { %3832 = vadd.xlane.f32.xlu0 %v3831_v40 }
 0x782   :  { %v7348_v19 = vpop.eup %7347 }
 0x783   :  { %v3837_v20 = vsel %vm317_vm2, %v7348_v19, 0.0 }
 0x784   :  { %3838 = vadd.xlane.f32.xlu0 %v3837_v20 }
 0x79a   :  { %4315 = vrot.lane.b32.xlu0 %v7672_v53, %s7497_s24 }
 0x79e   :  { %4606 = vrot.lane.b32.xlu0 %v7636_v41, %s7498_s25 }
 0x7a2   :  { %4682 = vrot.lane.b32.xlu0 %v7632_v37, %s7498_s25 }
 0x7a6   :  { %4830 = vrot.lane.b32.xlu0 %v7657_v48, %s7498_s25 }
 0x7aa   :  { %4978 = vrot.lane.b32.xlu0 %v7663_v51, %s7498_s25 }
 0x7ae   :  { %5126 = vrot.lane.b32.xlu0 %v7679_v54, %s7498_s25 }
 0x801   :  { %v3821_v5 = vpop.xlane.xlu0 %3820 }
 0x802   :  { %7349 = vrcp.f32 %v3821_v5 }
 0x805   :  { %v3827_v6 = vpop.xlane.xlu0 %3826 }
 0x806   :  { %7351 = vrcp.f32 %v3827_v6 }
 0x809   :  { %v3833_v13 = vpop.xlane.xlu0 %3832 }
 0x80a   :  { %7353 = vrcp.f32 %v3833_v13 }
 0x80d   :  { %v3839_v21 = vpop.xlane.xlu0 %3838 }
 0x80e   :  { %7355 = vrcp.f32 %v3839_v21 }
 0x80f   :  { %v7350_v22 = vpop.eup %7349 }
 0x810   :  { %v3851_v52 = vmul.f32 %v7350_v22, %v7342_v12 }
 0x811   :  { %v4316_v59 = vpop.permute.xlu0 %4315 }
 0x812   :  { %7082 = vmatmul.mubr.msk.f32.vlgmr.msra.gmra.mxu1 %vm317_vm2, %v3851_v52 }
 0x813   :  { %v7352_v8 = vpop.eup %7351  ;;  %7090 = vmatpush3.msra.mxu1 %v8127_v7  ;;  %7091 = vmatprep.mubr.msk.f32.mxu1 %vm7492_vm0, %v7491_v0 }
 0x814   :  { %7099 = vmatprep.subr.mxu1 %v7491_v0  ;;  %v3853_v36 = vmul.f32 %v7352_v8, %v7344_v15 }
 0x815   :  { %v4607_v60 = vpop.permute.xlu0 %4606 }
 0x816   :  { %7092 = vmatmul.mubr.msk.f32.vlgmr.msra.gmra.mxu1 %vm317_vm2, %v3853_v36  ;;  %7134 = vmatpush3.xpose.msk.msra.mxu0 %vm317_vm2, %v4607_v60 }
 0x817   :  { %v7354_v57 = vpop.eup %7353  ;;  %7100 = vmatpush3.msra.mxu1 %v4164_v47  ;;  %7101 = vmatprep.mubr.msk.f32.mxu1 %vm7492_vm0, %v7491_v0 }
 0x818   :  { %7109 = vmatprep.subr.mxu1 %v7491_v0  ;;  %7138 = vmatprep.subr.mxu0 %v7491_v0  ;;  %v3855_v7 = vmul.f32 %v7354_v57, %v7346_v16 }
 0x819   :  { %v4683_v61 = vpop.permute.xlu0 %4682  ;;  %7136 = vmatmul.mubr.msk.f32.vlgmr.msra.gmra.mxu0 %vm317_vm2, %v8169_v62 }
 0x81a   :  { %7102 = vmatmul.mubr.msk.f32.vlgmr.msra.gmra.mxu1 %vm317_vm2, %v3855_v7  ;;  %7139 = vmatpush3.xpose.msk.msra.mxu0 %vm317_vm2, %v4683_v61 }
 0x81b   :  { %v7356_v63 = vpop.eup %7355  ;;  %7110 = vmatpush3.msra.mxu1 %v4316_v59  ;;  %7140 = vmatprep.mubr.msk.f32.mxu0 %vm7492_vm0, %v7491_v0 }
 0x81c   :  { %7111 = vmatprep.mubr.msk.f32.mxu1 %vm7492_vm0, %v7491_v0  ;;  %7143 = vmatprep.subr.mxu0 %v7491_v0  ;;  %v3857_v2 = vmul.f32 %v7356_v63, %v7348_v19  ;;  %v4905_v19 = vpop.permute.xlu1 %4904 }
 0x81d   :  { %v4831_v43 = vpop.permute.xlu0 %4830  ;;  %7141 = vmatmul.mubr.msk.f32.vlgmr.msra.gmra.mxu0 %vm317_vm2, %v8169_v62  ;;  %7119 = vmatprep.subr.mxu1 %v88_v55 }
 0x81e   :  { %7112 = vmatmul.mubr.msk.f32.vlgmr.msra.gmra.mxu1 %vm317_vm2, %v3857_v2  ;;  %7144 = vmatpush3.xpose.msk.msra.mxu0 %vm317_vm2, %v4757_v14 }
 0x81f   :  { %7145 = vmatprep.mubr.msk.f32.mxu0 %vm7492_vm0, %v7491_v0  ;;  %7148 = vmatprep.subr.mxu0 %v7491_v0 }
 0x820   :  { %7120 = vmatpush3.msra.mxu1 %v88_v55  ;;  %v5053_v14 = vpop.permute.xlu1 %5052 }
 0x821   :  { %7146 = vmatmul.mubr.msk.f32.vlgmr.msra.gmra.mxu0 %vm317_vm2, %v8169_v62  ;;  %7153 = vmatprep.subr.mxu1 %v7491_v0  ;;  %v4979_v4 = vpop.permute.xlu0 %4978 }
 0x822   :  { %v4007_v3 = vpop.f32.mrf.mxu0  ;;  %7149 = vmatpush3.xpose.msk.msra.mxu0 %vm317_vm2, %v4831_v43  ;;  %7150 = vmatprep.mubr.msk.f32.mxu0 %vm7492_vm0, %v7491_v0 }
 0x823   :  { %7158 = vmatprep.subr.mxu0 %v7491_v0 }
 0x824   :  { %v7088_v11 = vpop.f32.mrf.mxu0 }
 0x825   :  { %7151 = vmatmul.mubr.msk.f32.vlgmr.msra.gmra.mxu0 %vm317_vm2, %v8169_v62  ;;  %v5127_v24 = vpop.permute.xlu0 %5126 }
 0x826   :  { %7159 = vmatpush3.xpose.msk.msra.mxu0 %vm317_vm2, %v4979_v4  ;;  %7160 = vmatprep.mubr.msk.f32.mxu0 %vm7492_vm0, %v7491_v0 }
 0x827   :  { %7168 = vmatprep.subr.mxu0 %v7491_v0 }
 0x829   :  { %7161 = vmatmul.mubr.msk.f32.vlgmr.msra.gmra.mxu0 %vm317_vm2, %v8169_v62 }
 0x82a   :  { %v4159_v1 = vpop.f32.mrf.mxu0  ;;  %7169 = vmatpush3.xpose.msk.msra.mxu0 %vm317_vm2, %v5127_v24  ;;  %7170 = vmatprep.mubr.msk.f32.mxu0 %vm7492_vm0, %v7491_v0 }
 0x82b   :  { %7178 = vmatprep.subr.mxu0 %v7491_v0 }
 0x82c   :  { %v7098_v12 = vpop.f32.mrf.mxu0 }
 0x82d   :  { %7171 = vmatmul.mubr.msk.f32.vlgmr.msra.gmra.mxu0 %vm317_vm2, %v8169_v62 }
 0x82e   :  { %v4311_v17 = vpop.f32.mrf.mxu0  ;;  %7180 = vmatprep.mubr.msk.f32.mxu0 %vm7492_vm0, %v7491_v0 }
 0x830   :  { %v7108_v15 = vpop.f32.mrf.mxu0 }
 0x832   :  { %v4463_v9 = vpop.f32.mrf.mxu0 }
 0x834   :  { %v7118_v16 = vpop.f32.mrf.mxu0 }
 0x8d2   :  { %v3931_v40 = vpop.f32.mrf.mxu1 }
 0x8d3   :  { %7121 = vmatprep.mubr.msk.f32.mxu1 %vm317_vm2, %v3931_v40 }
 0x8d4   :  { %v7083_v20 = vpop.f32.mrf.mxu1  ;;  %7122 = vmatmul.mubr.msk.f32.vlgmr.msra.gmra.mxu1 %vm317_vm2, %v4007_v3 }
 0x8d5   :  { %7154 = vmatpush3.xpose.msk.msra.mxu1 %vm317_vm2, %v4905_v19 }
 0x8d6   :  { %v4083_v47 = vpop.f32.mrf.mxu1  ;;  %7163 = vmatprep.subr.mxu1 %v7491_v0 }
 0x8d7   :  { %7124 = vmatprep.mubr.msk.f32.mxu1 %vm317_vm2, %v4083_v47 }
 0x8d8   :  { %v7093_v5 = vpop.f32.mrf.mxu1  ;;  %7125 = vmatmul.mubr.msk.f32.gmra.mxu1 %vm317_vm2, %v4159_v1 }
 0x8d9   :  { %v4678_v6 = vpop.f32.mrf.mxu0 }
 0x8da   :  { %v8220_v13 = vmul.f32 0.35355338, %v4678_v6  ;;  %v4235_v21 = vpop.f32.mrf.mxu1 }
 0x8db   :  { %7127 = vmatprep.mubr.msk.f32.mxu1 %vm317_vm2, %v4235_v21  ;;  %v7137_v22 = vpop.f32.mrf.mxu0 }
 0x8dc   :  { %v7103_v52 = vpop.f32.mrf.mxu1  ;;  %7128 = vmatmul.mubr.msk.f32.gmra.mxu1 %vm317_vm2, %v4311_v17  ;;  %v5208_v59 = vsel %vm317_vm2, %v8220_v13, -inf }
 0x8dd   :  { %5209 = vmax.xlane.f32.xlu1 %v5208_v59  ;;  %v4752_v8 = vpop.f32.mrf.mxu0 }
 0x8de   :  { %v5201_v36 = vmul.f32 0.35355338, %v4752_v8  ;;  %v4387_v60 = vpop.f32.mrf.mxu1 }
 0x8df   :  { %7130 = vmatprep.mubr.msk.f32.mxu1 %vm317_vm2, %v4387_v60  ;;  %v7142_v57 = vpop.f32.mrf.mxu0 }
 0x8e0   :  { %v7113_v7 = vpop.f32.mrf.mxu1  ;;  %7131 = vmatmul.mubr.msk.f32.gmra.mxu1 %vm317_vm2, %v4463_v9  ;;  %v5211_v61 = vsel %vm317_vm2, %v5201_v36, -inf }
 0x8e1   :  { %5212 = vmax.xlane.f32.xlu0 %v5211_v61  ;;  %v4826_v55 = vpop.f32.mrf.mxu0  ;;  %7155 = vmatprep.mubr.msk.f32.mxu1 %vm7492_vm0, %v7491_v0 }
 0x8e2   :  { %v8231_v63 = vmul.f32 0.35355338, %v4826_v55 }
 0x8e3   :  { %v7147_v2 = vpop.f32.mrf.mxu0 }
 0x8e4   :  { %7156 = vmatmul.mubr.msk.f32.vlgmr.msra.gmra.mxu1 %vm317_vm2, %v8169_v62  ;;  %v5214_v43 = vsel %vm317_vm2, %v8231_v63, -inf }
 0x8e5   :  { %7164 = vmatpush3.xpose.msk.msra.mxu1 %vm317_vm2, %v5053_v14  ;;  %5215 = vmax.xlane.f32.xlu0 %v5214_v43  ;;  %v4900_v3 = vpop.f32.mrf.mxu0 }
 0x8e6   :  { %v5203_v4 = vmul.f32 0.35355338, %v4900_v3  ;;  %7165 = vmatprep.mubr.msk.f32.mxu1 %vm7492_vm0, %v7491_v0  ;;  %7173 = vmatprep.subr.mxu1 %v7491_v0 }
 0x8e7   :  { %v7152_v11 = vpop.f32.mrf.mxu0 }
 0x8e8   :  { %7166 = vmatmul.mubr.msk.f32.vlgmr.msra.gmra.mxu1 %vm317_vm2, %v8169_v62  ;;  %v5217_v24 = vsel %vm317_vm2, %v5203_v4, -inf  ;;  %v3134_v11 = vadd.f32 %v8023_v33, %v8065_v10 }
 0x8e9   :  { %5218 = vmax.xlane.f32.xlu0 %v5217_v24  ;;  %v5048_v1 = vpop.f32.mrf.mxu0  ;;  %7175 = vmatprep.mubr.msk.f32.mxu1 %vm7492_vm0, %v7491_v0 }
 0x8ea   :  { %v5205_v12 = vmul.f32 0.35355338, %v5048_v1 }
 0x8eb   :  { %v7162_v17 = vpop.f32.mrf.mxu0 }
 0x8ec   :  { %v5223_v15 = vsel %vm317_vm2, %v5205_v12, -inf }
 0x8ed   :  { %5224 = vmax.xlane.f32.xlu0 %v5223_v15  ;;  %v5196_v9 = vpop.f32.mrf.mxu0 }
 0x8ee   :  { %v5207_v16 = vmul.f32 0.35355338, %v5196_v9  ;;  %v3144_v9 = vadd.f32 %v8033_v25, %v8074_v23  ;;  %v3149_v23 = vadd.f32 %v8048_v42, %v8086_v50 }
 0x8ef   :  { %v7172_v40 = vpop.f32.mrf.mxu0 }
 0x8f0   :  { %v5229_v19 = vsel %vm317_vm2, %v5207_v16, -inf }
 0x8f1   :  { %5230 = vmax.xlane.f32.xlu0 %v5229_v19 }
 0x966   :  { %v5210_v24 = vpop.xlane.xlu1 %5209 }
 0x96a   :  { %v5213_v20 = vpop.xlane.xlu0 %5212 }
 0x96b   :  { %v5233_v62 = vsub.f32 %v5201_v36, %v5213_v20  ;;  %v3139_v20 = vadd.f32 %v8038_v38, %v8078_v26  ;;  %v3164_v38 = vadd.f32 %v8053_v44, %v8090_v56 }
 0x96d   :  { %v5242_v47 = vmul.f32 1.442695, %v5233_v62 }
 0x96e   :  { %v5216_v5 = vpop.xlane.xlu0 %5215 }
 0x96f   :  { %7357 = vpow2.f32 %v5242_v47  ;;  %v5234_v62 = vsub.f32 %v8231_v63, %v5216_v5 }
 0x971   :  { %v5244_v26 = vmul.f32 1.442695, %v5234_v62 }
 0x972   :  { %v5219_v6 = vpop.xlane.xlu0 %5218 }
 0x973   :  { %v5235_v21 = vsub.f32 %v5203_v4, %v5219_v6 }
 0x975   :  { %v5246_v22 = vmul.f32 1.442695, %v5235_v21 }
 0x976   :  { %v5225_v52 = vpop.xlane.xlu0 %5224 }
 0x977   :  { %7359 = vpow2.f32 %v5246_v22  ;;  %v5237_v59 = vsub.f32 %v5205_v12, %v5225_v52  ;;  %v3129_v12 = vadd.f32 %v8028_v34, %v8070_v18  ;;  %v3154_v34 = vadd.f32 %v8043_v39, %v8082_v35 }
 0x978   :  { %v3159_v35 = vadd.f32 %v8057_v46, %v8092_v58 }
 0x979   :  { %v5250_v8 = vmul.f32 1.442695, %v5237_v59 }
 0x97a   :  { %v5231_v60 = vpop.xlane.xlu0 %5230 }
 0x97b   :  { %7361 = vpow2.f32 %v5250_v8  ;;  %v5239_v57 = vsub.f32 %v5207_v16, %v5231_v60  ;;  %v5232_v16 = vsub.f32 %v8220_v13, %v5210_v24 }
 0x97c   :  { %v8248_v7 = vpop.eup %7357 }
 0x97d   :  { %v5254_v61 = vmul.f32 1.442695, %v5239_v57  ;;  %v5259_v55 = vsel %vm317_vm2, %v8248_v7, 0.0  ;;  %v5240_v18 = vmul.f32 1.442695, %v5232_v16 }
 0x97e   :  { %5260 = vadd.xlane.f32.xlu0 %v5259_v55 }
 0x97f   :  { %7363 = vpow2.f32 %v5254_v61 }
 0x980   :  { %7365 = vpow2.f32 %v5240_v18 }
 0x981   :  { %7367 = vpow2.f32 %v5244_v26 }
 0x984   :  { %v8252_v36 = vpop.eup %7359 }
 0x985   :  { %v5265_v2 = vsel %vm317_vm2, %v8252_v36, 0.0 }
 0x986   :  { %5266 = vadd.xlane.f32.xlu0 %v5265_v2 }
 0x988   :  { %v8256_v14 = vpop.eup %7361 }
 0x989   :  { %v5271_v43 = vsel %vm317_vm2, %v8256_v14, 0.0 }
 0x98a   :  { %5272 = vadd.xlane.f32.xlu0 %v5271_v43 }
 0x98c   :  { %v8260_v3 = vpop.eup %7363 }
 0x98d   :  { %v5277_v4 = vsel %vm317_vm2, %v8260_v3, 0.0  ;;  %v7366_v8 = vpop.eup %7365 }
 0x98e   :  { %5278 = vadd.xlane.f32.xlu0 %v5277_v4  ;;  %v7368_v60 = vpop.eup %7367 }
 0x98f   :  { %v5262_v57 = vsel %vm317_vm2, %v7368_v60, 0.0 }
 0x994   :  { %v7123_v1 = vpop.f32.mrf.mxu1 }
 0x995   :  { %v8268_v17 = vadd.f32 %v7123_v1, %v3134_v11 }
 0x996   :  { %v4557_v15 = vpop.f32.mrf.mxu1 }
 0x997   :  { %v8273_v40 = vadd.f32 %v4557_v15, %v3129_v12 }
 0x998   :  { %v7126_v19 = vpop.f32.mrf.mxu1 }
 0x999   :  { %v8277_v33 = vadd.f32 %v7126_v19, %v3144_v9 }
 0x99a   :  { %v4567_v10 = vpop.f32.mrf.mxu1 }
 0x99b   :  { %v8282_v47 = vadd.f32 %v4567_v10, %v3139_v20 }
 0x99c   :  { %v7129_v25 = vpop.f32.mrf.mxu1 }
 0x99d   :  { %v8286_v13 = vadd.f32 %v7129_v25, %v3154_v34 }
 0x99e   :  { %v4577_v6 = vpop.f32.mrf.mxu1 }
 0x99f   :  { %v8290_v21 = vadd.f32 %v4577_v6, %v3149_v23 }
 0x9a0   :  { %v7132_v39 = vpop.f32.mrf.mxu1 }
 0x9a1   :  { %v8294_v63 = vadd.f32 %v7132_v39, %v3164_v38 }
 0x9a2   :  { %v4587_v5 = vpop.f32.mrf.mxu1 }
 0x9a3   :  { %v8296_v22 = vadd.f32 %v4587_v5, %v3159_v35 }
 0x9a4   :  { %v4974_v42 = vpop.f32.mrf.mxu1  ;;  %5372 = vrot.lane.b32.xlu0 %v7632_v37, %s7499_s26  ;;  %v5256_v37 = vsel %vm317_vm2, %v7366_v8, 0.0 }
 0x9a5   :  { %v5204_v44 = vmul.f32 0.35355338, %v4974_v42 }
 0x9a6   :  { %v7157_v50 = vpop.f32.mrf.mxu1 }
 0x9a7   :  { %v5220_v56 = vsel %vm317_vm2, %v5204_v44, -inf }
 0x9a8   :  { %v5122_v52 = vpop.f32.mrf.mxu1  ;;  %5221 = vmax.xlane.f32.xlu1 %v5220_v56  ;;  %5676 = vrot.lane.b32.xlu0 %v7663_v51, %s7499_s26 }
 0x9a9   :  { %v5206_v46 = vmul.f32 0.35355338, %v5122_v52 }
 0x9aa   :  { %v7167_v58 = vpop.f32.mrf.mxu1 }
 0x9ab   :  { %v5226_v59 = vsel %vm317_vm2, %v5206_v46, -inf }
 0x9ac   :  { %5227 = vmax.xlane.f32.xlu1 %v5226_v59  ;;  %5828 = vrot.lane.b32.xlu0 %v7679_v54, %s7499_s26 }
 0x9b0   :  { %5257 = vadd.xlane.f32.xlu1 %v5256_v37 }
 0x9b4   :  { %5263 = vadd.xlane.f32.xlu1 %v5262_v57 }
 0x9c5   :  { %5296 = vrot.lane.b32.xlu1 %v7636_v41, %s7499_s26 }
 0x9c9   :  { %5448 = vrot.lane.b32.xlu1 %v7646_v45, %s7499_s26 }
 0x9cd   :  { %5524 = vrot.lane.b32.xlu1 %v7657_v48, %s7499_s26 }
 0x9d1   :  { %5600 = vrot.lane.b32.xlu1 %v7659_v49, %s7499_s26 }
 0xa07   :  { %v5261_v51 = vpop.xlane.xlu0 %5260 }
 0xa08   :  { %7369 = vrcp.f32 %v5261_v51 }
 0xa0f   :  { %v5267_v54 = vpop.xlane.xlu0 %5266 }
 0xa13   :  { %v5273_v61 = vpop.xlane.xlu0 %5272 }
 0xa15   :  { %v7370_v2 = vpop.eup %7369 }
 0xa16   :  { %v5289_v4 = vmul.f32 %v7370_v2, %v8248_v7 }
 0xa17   :  { %v5279_v55 = vpop.xlane.xlu0 %5278 }
 0xa1b   :  { %v5373_v43 = vpop.permute.xlu0 %5372 }
 0xa1c   :  { %7179 = vmatpush3.msra.mxu0 %v5373_v43 }
 0xa1d   :  { %7181 = vmatmul.mubr.msk.f32.vlgmr.msra.gmra.mxu0 %vm317_vm2, %v5289_v4  ;;  %7188 = vmatprep.subr.mxu0 %v7491_v0 }
 0xa1e   :  { %7190 = vmatprep.mubr.msk.f32.mxu0 %vm7492_vm0, %v7491_v0 }
 0xa1f   :  { %v5677_v6 = vpop.permute.xlu0 %5676 }
 0xa23   :  { %v5829_v5 = vpop.permute.xlu0 %5828 }
 0xa31   :  { %v5222_v41 = vpop.xlane.xlu1 %5221 }
 0xa32   :  { %v5236_v45 = vsub.f32 %v5204_v44, %v5222_v41 }
 0xa34   :  { %v5248_v48 = vmul.f32 1.442695, %v5236_v45 }
 0xa35   :  { %v5228_v49 = vpop.xlane.xlu1 %5227 }
 0xa36   :  { %7371 = vpow2.f32 %v5248_v48  ;;  %v5238_v11 = vsub.f32 %v5206_v46, %v5228_v49  ;;  %v89_v46 = vld [vmem:[#allocation4 + $0x18] sm:$0xff] }
 0xa37   :  { %7373 = vrcp.f32 %v5267_v54 }
 0xa38   :  { %v5252_v24 = vmul.f32 1.442695, %v5238_v11 }
 0xa39   :  { %v5258_v1 = vpop.xlane.xlu1 %5257 }
 0xa3a   :  { %7375 = vpow2.f32 %v5252_v24  ;;  %v71_v24 = vld [vmem:[%s8581_s1 + $0x8] sm:$0xff] }
 0xa3b   :  { %7377 = vrcp.f32 %v5258_v1 }
 0xa3c   :  { %7379 = vrcp.f32 %v5273_v61 }
 0xa3d   :  { %v5264_v7 = vpop.xlane.xlu1 %5263 }
 0xa3e   :  { %7381 = vrcp.f32 %v5264_v7 }
 0xa3f   :  { %7383 = vrcp.f32 %v5279_v55 }
 0xa41   :  { %v5297_v12 = vpop.permute.xlu1 %5296 }
 0xa42   :  { %7174 = vmatpush3.msra.mxu1 %v5297_v12 }
 0xa43   :  { %v7372_v15 = vpop.eup %7371  ;;  %7183 = vmatprep.subr.mxu1 %v7491_v0 }
 0xa44   :  { %v5268_v9 = vsel %vm317_vm2, %v7372_v15, 0.0  ;;  %v7374_v19 = vpop.eup %7373 }
 0xa45   :  { %5269 = vadd.xlane.f32.xlu1 %v5268_v9  ;;  %v5449_v16 = vpop.permute.xlu1 %5448  ;;  %v5291_v25 = vmul.f32 %v7374_v19, %v8252_v36 }
 0xa47   :  { %v7376_v20 = vpop.eup %7375 }
 0xa48   :  { %v7378_v10 = vpop.eup %7377  ;;  %v5274_v34 = vsel %vm317_vm2, %v7376_v20, 0.0 }
 0xa49   :  { %5275 = vadd.xlane.f32.xlu1 %v5274_v34  ;;  %v5525_v18 = vpop.permute.xlu1 %5524  ;;  %v5288_v62 = vmul.f32 %v7378_v10, %v7366_v8  ;;  %v7380_v23 = vpop.eup %7379  ;;  %v7421_v10 = vld [vmem:[%s8581_s1] sm:$0xff] }
 0xa4a   :  { %7189 = vmatpush3.msra.mxu0 %v5525_v18  ;;  %v5293_v36 = vmul.f32 %v7380_v23, %v8256_v14 }
 0xa4b   :  { %v7382_v38 = vpop.eup %7381  ;;  %7176 = vmatmul.mubr.msk.f32.vlgmr.msra.gmra.mxu1 %vm317_vm2, %v5288_v62  ;;  %7191 = vmatmul.mubr.msk.f32.vlgmr.msra.gmra.mxu0 %vm317_vm2, %v5291_v25 }
 0xa4c   :  { %7184 = vmatpush3.msra.mxu1 %v5449_v16  ;;  %7198 = vmatprep.subr.mxu0 %v7491_v0  ;;  %v5290_v26 = vmul.f32 %v7382_v38, %v7368_v60  ;;  %v7384_v35 = vpop.eup %7383 }
 0xa4d   :  { %7199 = vmatpush3.msra.mxu0 %v5677_v6  ;;  %7185 = vmatprep.mubr.msk.f32.mxu1 %vm7492_vm0, %v7491_v0  ;;  %v5601_v39 = vpop.permute.xlu1 %5600  ;;  %v5295_v42 = vmul.f32 %v7384_v35, %v8260_v3 }
 0xa4e   :  { %7193 = vmatprep.subr.mxu1 %v7491_v0  ;;  %7200 = vmatprep.mubr.msk.f32.mxu0 %vm7492_vm0, %v7491_v0 }
 0xa4f   :  { %7186 = vmatmul.mubr.msk.f32.vlgmr.msra.gmra.mxu1 %vm317_vm2, %v5290_v26  ;;  %7208 = vmatprep.subr.mxu0 %v7491_v0 }
 0xa50   :  { %7194 = vmatpush3.msra.mxu1 %v5601_v39  ;;  %7201 = vmatmul.mubr.msk.f32.vlgmr.msra.gmra.mxu0 %vm317_vm2, %v5293_v36 }
 0xa51   :  { %7209 = vmatpush3.msra.mxu0 %v5829_v5  ;;  %7210 = vmatprep.mubr.msk.f32.mxu0 %vm7492_vm0, %v7491_v0 }
 0xa52   :  { %7195 = vmatprep.mubr.msk.f32.mxu1 %vm7492_vm0, %v7491_v0  ;;  %7203 = vmatprep.subr.mxu1 %v7491_v0 }
 0xa54   :  { %7211 = vmatmul.mubr.msk.f32.vlgmr.msra.gmra.mxu0 %vm317_vm2, %v5295_v42 }
 0xa5a   :  { %5752 = vrot.lane.b32.xlu1 %v7672_v53, %s7499_s26 }
 0xace   :  { %v5270_v14 = vpop.xlane.xlu1 %5269 }
 0xacf   :  { %7385 = vrcp.f32 %v5270_v14  ;;  %v75_v14 = vld [vmem:[%s8581_s1 + $0x28] sm:$0xff] }
 0xad2   :  { %v5276_v44 = vpop.xlane.xlu1 %5275 }
 0xad3   :  { %7387 = vrcp.f32 %v5276_v44 }
 0xad6   :  { %v5753_v58 = vpop.permute.xlu1 %5752 }
 0xadc   :  { %v7386_v50 = vpop.eup %7385 }
 0xadd   :  { %v5444_v56 = vpop.f32.mrf.mxu0  ;;  %v5292_v52 = vmul.f32 %v7386_v50, %v7372_v15 }
 0xadf   :  { %v7182_v3 = vpop.f32.mrf.mxu0  ;;  %7196 = vmatmul.mubr.msk.f32.vlgmr.msra.gmra.mxu1 %vm317_vm2, %v5292_v52 }
 0xae0   :  { %v7388_v59 = vpop.eup %7387  ;;  %7204 = vmatpush3.msra.mxu1 %v5753_v58  ;;  %7205 = vmatprep.mubr.msk.f32.mxu1 %vm7492_vm0, %v7491_v0  ;;  %v74_v58 = vld [vmem:[%s8581_s1 + $0x20] sm:$0xff] }
 0xae1   :  { %v5294_v8 = vmul.f32 %v7388_v59, %v7376_v20  ;;  %7213 = vmatprep.subr.mxu1 %v89_v46 }
 0xae3   :  { %7206 = vmatmul.mubr.msk.f32.vlgmr.msra.gmra.mxu1 %vm317_vm2, %v5294_v8 }
 0xae4   :  { %7214 = vmatpush3.msra.mxu1 %v89_v46 }
 0xb0b   :  { %v5368_v53 = vpop.f32.mrf.mxu1  ;;  %v5596_v37 = vpop.f32.mrf.mxu0 }
 0xb0c   :  { %7215 = vmatprep.mubr.msk.f32.mxu1 %vm317_vm2, %v5368_v53 }
 0xb0d   :  { %v7177_v60 = vpop.f32.mrf.mxu1  ;;  %7216 = vmatmul.mubr.msk.f32.vlgmr.msra.gmra.mxu1 %vm317_vm2, %v5444_v56  ;;  %v7192_v57 = vpop.f32.mrf.mxu0 }
 0xb0f   :  { %v5520_v51 = vpop.f32.mrf.mxu1 }
 0xb10   :  { %v5748_v54 = vpop.f32.mrf.mxu0  ;;  %7218 = vmatprep.mubr.msk.f32.mxu1 %vm317_vm2, %v5520_v51 }
 0xb11   :  { %v7187_v61 = vpop.f32.mrf.mxu1  ;;  %7219 = vmatmul.mubr.msk.f32.gmra.mxu1 %vm317_vm2, %v5596_v37  ;;  %v77_v37 = vld [vmem:[%s8581_s1 + $0x38] sm:$0xff] }
 0xb12   :  { %v7202_v0 = vpop.f32.mrf.mxu0 }
 0xb14   :  { %v5900_v55 = vpop.f32.mrf.mxu0 }
 0xb16   :  { %v7212_v2 = vpop.f32.mrf.mxu0 }
 0xb9f   :  { %v5672_v43 = vpop.f32.mrf.mxu1 }
 0xba0   :  { %7221 = vmatprep.mubr.msk.f32.mxu1 %vm317_vm2, %v5672_v43 }
 0xba1   :  { %v7197_v4 = vpop.f32.mrf.mxu1  ;;  %7222 = vmatmul.mubr.msk.f32.gmra.mxu1 %vm317_vm2, %v5748_v54 }
 0xba3   :  { %v5824_v41 = vpop.f32.mrf.mxu1 }
 0xba4   :  { %7224 = vmatprep.mubr.msk.f32.mxu1 %vm317_vm2, %v5824_v41 }
 0xba5   :  { %v7207_v45 = vpop.f32.mrf.mxu1  ;;  %7225 = vmatmul.mubr.msk.f32.gmra.mxu1 %vm317_vm2, %v5900_v55 }
 0xbcd   :  { %v7217_v48 = vpop.f32.mrf.mxu1 }
 0xbce   :  { %v6034_v49 = vadd.f32 %v7217_v48, %v8268_v17 }
 0xbcf   :  { %v5994_v11 = vpop.f32.mrf.mxu1 }
 0xbd0   :  { %v6046_v1 = vadd.f32 %v7617_v27, %v6034_v49  ;;  %v6033_v7 = vadd.f32 %v5994_v11, %v8273_v40  ;;  %v72_v40 = vld [vmem:[%s8581_s1 + $0x10] sm:$0xff] }
 0xbd1   :  { %v7220_v12 = vpop.f32.mrf.mxu1 }
 0xbd2   :  { %v6045_v15 = vadd.f32 %v7617_v27, %v6033_v7  ;;  %v6036_v9 = vadd.f32 %v7220_v12, %v8277_v33  ;;  %v6054_v16 = vadd.f32 %v6046_v1, %v71_v24 }
 0xbd3   :  { %v6004_v19 = vpop.f32.mrf.mxu1 }
 0xbd4   :  { %v6035_v20 = vadd.f32 %v6004_v19, %v8282_v47  ;;  %v6064_v17 = vsel %vm100_vm1, %v6054_v16, 0.0  ;;  %v6053_v34 = vadd.f32 %v7421_v10, %v6045_v15  ;;  %v6048_v18 = vadd.f32 %v7617_v27, %v6036_v9  ;;  %v73_v47 = vld [vmem:[%s8581_s1 + $0x18] sm:$0xff]  ;;  %v92_v19 = vld [vmem:[#allocation6 + $0x10] sm:$0xff] }
 0xbd5   :  { %6065 = vadd.xlane.f32.xlu0 %v6064_v17  ;;  %v90_v17 = vld [vmem:[#allocation6] sm:$0xff] }
 0xbd6   :  { %v6047_v33 = vadd.f32 %v7617_v27, %v6035_v20  ;;  %v6061_v62 = vsel %vm100_vm1, %v6053_v34, 0.0  ;;  %v6056_v6 = vadd.f32 %v6048_v18, %v73_v47  ;;  %v91_v20 = vld [vmem:[#allocation6 + $0x8] sm:$0xff] }
 0xbd7   :  { %6062 = vadd.xlane.f32.xlu1 %v6061_v62 }
 0xbd8   :  { %v6055_v25 = vadd.f32 %v6047_v33, %v72_v40  ;;  %v6070_v38 = vsel %vm100_vm1, %v6056_v6, 0.0 }
 0xbda   :  { %v6067_v23 = vsel %vm100_vm1, %v6055_v25, 0.0 }
 0xbdb   :  { %6068 = vadd.xlane.f32.xlu0 %v6067_v23 }
 0xbdf   :  { %6071 = vadd.xlane.f32.xlu0 %v6070_v38 }
 0xc5e   :  { %v6066_v26 = vpop.xlane.xlu0 %6065 }
 0xc5f   :  { %v6087_v5 = vmul.f32 0.03125, %v6066_v26 }
 0xc60   :  { %v6063_v36 = vpop.xlane.xlu1 %6062 }
 0xc61   :  { %v7223_v39 = vpop.f32.mrf.mxu1  ;;  %v6086_v52 = vmul.f32 0.03125, %v6063_v36  ;;  %v8393_v8 = vsub.f32 %v6054_v16, %v6087_v5  ;;  %v93_v16 = vld [vmem:[#allocation6 + $0x18] sm:$0xff] }
 0xc62   :  { %v6038_v35 = vadd.f32 %v7223_v39, %v8286_v13  ;;  %7227 = vmatprep.subr.mxu0 %v93_v16 }
 0xc63   :  { %v6014_v42 = vpop.f32.mrf.mxu1  ;;  %v8401_v61 = vsub.f32 %v6053_v34, %v6086_v52  ;;  %v6103_v48 = vmul.f32 %v8393_v8, %v8393_v8  ;;  %7228 = vmatpush3.msra.mxu0 %v93_v16 }
 0xc64   :  { %v6050_v44 = vadd.f32 %v7617_v27, %v6038_v35  ;;  %v6037_v50 = vadd.f32 %v6014_v42, %v8290_v21  ;;  %v6069_v56 = vpop.xlane.xlu0 %6068  ;;  %7229 = vmatprep.subr.mxu0 %v92_v19 }
 0xc65   :  { %v7226_v46 = vpop.f32.mrf.mxu1  ;;  %v6088_v55 = vmul.f32 0.03125, %v6069_v56  ;;  %v6113_v24 = vsel %vm100_vm1, %v6103_v48, 0.0  ;;  %7230 = vmatpush3.msra.mxu0 %v92_v19 }
 0xc66   :  { %v6049_v3 = vadd.f32 %v7617_v27, %v6037_v50  ;;  %v6040_v13 = vadd.f32 %v7226_v46, %v8294_v63  ;;  %v6058_v59 = vadd.f32 %v6050_v44, %v75_v14  ;;  %v76_v63 = vld [vmem:[%s8581_s1 + $0x30] sm:$0xff]  ;;  %7231 = vmatprep.subr.mxu0 %v91_v20 }
 0xc67   :  { %v6024_v53 = vpop.f32.mrf.mxu1  ;;  %v8413_v49 = vsub.f32 %v6055_v25, %v6088_v55  ;;  %7232 = vmatpush3.msra.mxu0 %v91_v20 }
 0xc68   :  { %v6052_v21 = vadd.f32 %v7617_v27, %v6040_v13  ;;  %v6039_v60 = vadd.f32 %v6024_v53, %v8296_v22  ;;  %v6072_v57 = vpop.xlane.xlu0 %6071  ;;  %v6076_v51 = vsel %vm100_vm1, %v6058_v59, 0.0  ;;  %v6057_v54 = vadd.f32 %v6049_v3, %v74_v58  ;;  %7233 = vmatprep.subr.mxu0 %v90_v17 }
 0xc69   :  { %v6089_v0 = vmul.f32 0.03125, %v6072_v57  ;;  %6077 = vadd.xlane.f32.xlu0 %v6076_v51  ;;  %v6104_v12 = vmul.f32 %v8413_v49, %v8413_v49  ;;  %7234 = vmatpush3.msra.mxu0 %v90_v17 }
 0xc6a   :  { %v6051_v2 = vadd.f32 %v7617_v27, %v6039_v60  ;;  %v6073_v43 = vsel %vm100_vm1, %v6057_v54, 0.0  ;;  %v6060_v4 = vadd.f32 %v6052_v21, %v77_v37  ;;  %v6102_v27 = vmul.f32 %v8401_v61, %v8401_v61 }
 0xc6b   :  { %6074 = vadd.xlane.f32.xlu1 %v6073_v43  ;;  %v8408_v22 = vsub.f32 %v6056_v6, %v6089_v0  ;;  %v6116_v9 = vsel %vm100_vm1, %v6104_v12, 0.0 }
 0xc6c   :  { %v6082_v41 = vsel %vm100_vm1, %v6060_v4, 0.0  ;;  %v6059_v45 = vadd.f32 %v6051_v2, %v76_v63  ;;  %v6110_v7 = vsel %vm100_vm1, %v6102_v27, 0.0 }
 0xc6d   :  { %6083 = vadd.xlane.f32.xlu0 %v6082_v41  ;;  %v6105_v1 = vmul.f32 %v8408_v22, %v8408_v22 }
 0xc6e   :  { %v6079_v11 = vsel %vm100_vm1, %v6059_v45, 0.0 }
 0xc6f   :  { %6080 = vadd.xlane.f32.xlu1 %v6079_v11  ;;  %v6119_v15 = vsel %vm100_vm1, %v6105_v1, 0.0 }
 0xc71   :  { %6114 = vadd.xlane.f32.xlu0 %v6113_v24 }
 0xc73   :  { %6111 = vadd.xlane.f32.xlu1 %v6110_v7 }
 0xc75   :  { %6120 = vadd.xlane.f32.xlu0 %v6119_v15 }
 0xc77   :  { %6117 = vadd.xlane.f32.xlu1 %v6116_v9 }
 0xcf2   :  { %v6078_v10 = vpop.xlane.xlu0 %6077 }
 0xcf3   :  { %v6091_v34 = vmul.f32 0.03125, %v6078_v10 }
 0xcf4   :  { %v6075_v40 = vpop.xlane.xlu1 %6074 }
 0xcf5   :  { %v8426_v18 = vsub.f32 %v6058_v59, %v6091_v34  ;;  %v6090_v33 = vmul.f32 0.03125, %v6075_v40 }
 0xcf6   :  { %v6084_v62 = vpop.xlane.xlu0 %6083 }
 0xcf7   :  { %v8428_v47 = vsub.f32 %v6057_v54, %v6090_v33  ;;  %v6093_v25 = vmul.f32 0.03125, %v6084_v62  ;;  %v6107_v23 = vmul.f32 %v8426_v18, %v8426_v18 }
 0xcf8   :  { %v6081_v6 = vpop.xlane.xlu1 %6080 }
 0xcf9   :  { %v8432_v38 = vsub.f32 %v6060_v4, %v6093_v25  ;;  %v6092_v26 = vmul.f32 0.03125, %v6081_v6  ;;  %v6125_v39 = vsel %vm100_vm1, %v6107_v23, 0.0  ;;  %v6106_v36 = vmul.f32 %v8428_v47, %v8428_v47 }
 0xcfa   :  { %6126 = vadd.xlane.f32.xlu0 %v6125_v39  ;;  %v6115_v35 = vpop.xlane.xlu0 %6114 }
 0xcfb   :  { %v8437_v5 = vsub.f32 %v6059_v45, %v6092_v26  ;;  %v6135_v42 = vmul.f32 0.03125, %v6115_v35  ;;  %v6122_v14 = vsel %vm100_vm1, %v6106_v36, 0.0  ;;  %v6109_v44 = vmul.f32 %v8432_v38, %v8432_v38 }
 0xcfc   :  { %6123 = vadd.xlane.f32.xlu1 %v6122_v14  ;;  %v6112_v50 = vpop.xlane.xlu1 %6111 }
 0xcfd   :  { %v6143_v56 = vadd.f32 1e-05, %v6135_v42  ;;  %v6134_v52 = vmul.f32 0.03125, %v6112_v50  ;;  %v6131_v46 = vsel %vm100_vm1, %v6109_v44, 0.0  ;;  %v6108_v58 = vmul.f32 %v8437_v5, %v8437_v5 }
 0xcfe   :  { %6132 = vadd.xlane.f32.xlu0 %v6131_v46  ;;  %v6121_v3 = vpop.xlane.xlu0 %6120 }
 0xcff   :  { %7389 = vrsqrt.f32 %v6143_v56  ;;  %v6142_v13 = vadd.f32 1e-05, %v6134_v52  ;;  %v6137_v59 = vmul.f32 0.03125, %v6121_v3  ;;  %v6128_v53 = vsel %vm100_vm1, %v6108_v58, 0.0 }
 0xd00   :  { %6129 = vadd.xlane.f32.xlu1 %v6128_v53  ;;  %v6118_v37 = vpop.xlane.xlu1 %6117 }
 0xd01   :  { %7391 = vrsqrt.f32 %v6142_v13  ;;  %v6145_v21 = vadd.f32 1e-05, %v6137_v59  ;;  %v6136_v60 = vmul.f32 0.03125, %v6118_v37 }
 0xd03   :  { %7393 = vrsqrt.f32 %v6145_v21  ;;  %v6144_v57 = vadd.f32 1e-05, %v6136_v60 }
 0xd05   :  { %7395 = vrsqrt.f32 %v6144_v57 }
 0xd0c   :  { %v7390_v51 = vpop.eup %7389 }
 0xd0d   :  { %v6159_v54 = vmul.f32 %v7390_v51, %v8393_v8 }
 0xd0e   :  { %v7392_v0 = vpop.eup %7391 }
 0xd0f   :  { %v6158_v63 = vmul.f32 %v7392_v0, %v8401_v61  ;;  %v6171_v2 = vmul.f32 %v7619_v28, %v6159_v54 }
 0xd10   :  { %v7394_v55 = vpop.eup %7393 }
 0xd11   :  { %v6170_v43 = vmul.f32 %v7619_v28, %v6158_v63  ;;  %v6161_v4 = vmul.f32 %v7394_v55, %v8408_v22  ;;  %v6183_v11 = vadd.f32 %v7621_v29, %v6171_v2 }
 0xd12   :  { %v7396_v41 = vpop.eup %7395 }
 0xd13   :  { %v6182_v45 = vadd.f32 %v7621_v29, %v6170_v43  ;;  %v6160_v48 = vmul.f32 %v7396_v41, %v8413_v49  ;;  %v6173_v27 = vmul.f32 %v7619_v28, %v6161_v4 }
 0xd15   :  { %7235 = vmatprep.mubr.msk.f32.mxu0 %vm100_vm1, %v6182_v45  ;;  %v6172_v8 = vmul.f32 %v7619_v28, %v6160_v48  ;;  %v6185_v24 = vadd.f32 %v7621_v29, %v6173_v27 }
 0xd16   :  { %7236 = vmatmul.mubr.msk.f32.vlgmr.msra.gmra.mxu0 %vm100_vm1, %v6183_v11 }
 0xd17   :  { %v6184_v61 = vadd.f32 %v7621_v29, %v6172_v8 }
 0xd19   :  { %7238 = vmatprep.mubr.msk.f32.mxu0 %vm100_vm1, %v6184_v61 }
 0xd1a   :  { %7239 = vmatmul.mubr.msk.f32.gmra.mxu0 %vm100_vm1, %v6185_v24 }
 0xd83   :  { %v6127_v22 = vpop.xlane.xlu0 %6126 }
 0xd84   :  { %v6139_v49 = vmul.f32 0.03125, %v6127_v22 }
 0xd85   :  { %v6124_v1 = vpop.xlane.xlu1 %6123 }
 0xd86   :  { %v6147_v7 = vadd.f32 1e-05, %v6139_v49  ;;  %v6138_v12 = vmul.f32 0.03125, %v6124_v1 }
 0xd87   :  { %v6133_v15 = vpop.xlane.xlu0 %6132 }
 0xd88   :  { %7397 = vrsqrt.f32 %v6147_v7  ;;  %v6146_v9 = vadd.f32 1e-05, %v6138_v12  ;;  %v6141_v16 = vmul.f32 0.03125, %v6133_v15 }
 0xd89   :  { %v6130_v19 = vpop.xlane.xlu1 %6129 }
 0xd8a   :  { %7399 = vrsqrt.f32 %v6146_v9  ;;  %v6149_v20 = vadd.f32 1e-05, %v6141_v16  ;;  %v6140_v17 = vmul.f32 0.03125, %v6130_v19 }
 0xd8c   :  { %7401 = vrsqrt.f32 %v6149_v20  ;;  %v6148_v10 = vadd.f32 1e-05, %v6140_v17 }
 0xd8e   :  { %7403 = vrsqrt.f32 %v6148_v10 }
 0xd95   :  { %v7398_v34 = vpop.eup %7397 }
 0xd96   :  { %v6163_v40 = vmul.f32 %v7398_v34, %v8426_v18 }
 0xd97   :  { %v7400_v33 = vpop.eup %7399 }
 0xd98   :  { %v6162_v62 = vmul.f32 %v7400_v33, %v8428_v47  ;;  %v6175_v23 = vmul.f32 %v7619_v28, %v6163_v40 }
 0xd99   :  { %v7402_v25 = vpop.eup %7401 }
 0xd9a   :  { %v6174_v6 = vmul.f32 %v7619_v28, %v6162_v62  ;;  %v6165_v26 = vmul.f32 %v7402_v25, %v8432_v38  ;;  %v6187_v42 = vadd.f32 %v7621_v29, %v6175_v23 }
 0xd9b   :  { %v7404_v39 = vpop.eup %7403 }
 0xd9c   :  { %v6186_v36 = vadd.f32 %v7621_v29, %v6174_v6  ;;  %v6164_v35 = vmul.f32 %v7404_v39, %v8437_v5  ;;  %v6177_v14 = vmul.f32 %v7619_v28, %v6165_v26 }
 0xd9e   :  { %7241 = vmatprep.mubr.msk.f32.mxu0 %vm100_vm1, %v6186_v36  ;;  %v6176_v18 = vmul.f32 %v7619_v28, %v6164_v35  ;;  %v6189_v44 = vadd.f32 %v7621_v29, %v6177_v14 }
 0xd9f   :  { %7242 = vmatmul.mubr.msk.f32.gmra.mxu0 %vm100_vm1, %v6187_v42 }
 0xda0   :  { %v6188_v47 = vadd.f32 %v7621_v29, %v6176_v18 }
 0xda2   :  { %7244 = vmatprep.mubr.msk.f32.mxu0 %vm100_vm1, %v6188_v47 }
 0xda3   :  { %7245 = vmatmul.mubr.msk.f32.gmra.mxu0 %vm100_vm1, %v6189_v44 }
 0xdd6   :  { %v7237_v38 = vpop.f32.mrf.mxu0 }
 0xdd7   :  { %v6290_v5 = vadd.f32 %v7237_v38, %v7623_v30 }
 0xdd8   :  { %v6284_v50 = vpop.f32.mrf.mxu0 }
 0xdd9   :  { %v6324_v56 = vmax.f32 %v6290_v5, 0.0  ;;  %v6285_v52 = vadd.f32 %v6284_v50, %v7623_v30 }
 0xdda   :  { %v7240_v46 = vpop.f32.mrf.mxu0 }
 0xddb   :  { %v6332_v58 = vadd.f32 %v6324_v56, %v6183_v11  ;;  %v6323_v28 = vmax.f32 %v6285_v52, 0.0  ;;  %v6300_v3 = vadd.f32 %v7240_v46, %v7623_v30 }
 0xddc   :  { %v6294_v13 = vpop.f32.mrf.mxu0 }
 0xddd   :  { %v6331_v59 = vadd.f32 %v6323_v28, %v6182_v45  ;;  %v6326_v53 = vmax.f32 %v6300_v3, 0.0  ;;  %v6295_v29 = vadd.f32 %v6294_v13, %v7623_v30  ;;  %v6342_v37 = vsel %vm100_vm1, %v6332_v58, 0.0 }
 0xdde   :  { %6343 = vadd.xlane.f32.xlu0 %v6342_v37 }
 0xddf   :  { %v6334_v21 = vadd.f32 %v6326_v53, %v6185_v24  ;;  %v6325_v60 = vmax.f32 %v6295_v29, 0.0  ;;  %v6339_v57 = vsel %vm100_vm1, %v6331_v59, 0.0 }
 0xde0   :  { %6340 = vadd.xlane.f32.xlu1 %v6339_v57 }
 0xde1   :  { %v6333_v51 = vadd.f32 %v6325_v60, %v6184_v61  ;;  %v6348_v54 = vsel %vm100_vm1, %v6334_v21, 0.0 }
 0xde2   :  { %6349 = vadd.xlane.f32.xlu0 %v6348_v54 }
 0xde3   :  { %v6345_v0 = vsel %vm100_vm1, %v6333_v51, 0.0 }
 0xde4   :  { %6346 = vadd.xlane.f32.xlu1 %v6345_v0 }
 0xe5f   :  { %v7243_v63 = vpop.f32.mrf.mxu0 }
 0xe60   :  { %v6310_v55 = vadd.f32 %v7243_v63, %v7623_v30 }
 0xe61   :  { %v6304_v2 = vpop.f32.mrf.mxu0 }
 0xe62   :  { %v6328_v43 = vmax.f32 %v6310_v55, 0.0  ;;  %v6305_v4 = vadd.f32 %v6304_v2, %v7623_v30 }
 0xe63   :  { %v7246_v41 = vpop.f32.mrf.mxu0 }
 0xe64   :  { %v6336_v45 = vadd.f32 %v6328_v43, %v6187_v42  ;;  %v6327_v48 = vmax.f32 %v6305_v4, 0.0  ;;  %v6320_v11 = vadd.f32 %v7246_v41, %v7623_v30 }
 0xe65   :  { %v6314_v27 = vpop.f32.mrf.mxu0 }
 0xe66   :  { %v6335_v8 = vadd.f32 %v6327_v48, %v6186_v36  ;;  %v6330_v61 = vmax.f32 %v6320_v11, 0.0  ;;  %v6315_v24 = vadd.f32 %v6314_v27, %v7623_v30  ;;  %v6354_v22 = vsel %vm100_vm1, %v6336_v45, 0.0 }
 0xe67   :  { %v6344_v49 = vpop.xlane.xlu0 %6343  ;;  %6355 = vadd.xlane.f32.xlu0 %v6354_v22 }
 0xe68   :  { %v6338_v1 = vadd.f32 %v6330_v61, %v6189_v44  ;;  %v6329_v7 = vmax.f32 %v6315_v24, 0.0  ;;  %v6364_v12 = vmul.f32 0.03125, %v6344_v49  ;;  %v6351_v15 = vsel %vm100_vm1, %v6335_v8, 0.0 }
 0xe69   :  { %6352 = vadd.xlane.f32.xlu1 %v6351_v15  ;;  %v6341_v9 = vpop.xlane.xlu1 %6340 }
 0xe6a   :  { %v6337_v16 = vadd.f32 %v6329_v7, %v6188_v47  ;;  %v8492_v19 = vsub.f32 %v6332_v58, %v6364_v12  ;;  %v6363_v20 = vmul.f32 0.03125, %v6341_v9  ;;  %v6360_v17 = vsel %vm100_vm1, %v6338_v1, 0.0 }
 0xe6b   :  { %v6350_v10 = vpop.xlane.xlu0 %6349  ;;  %6361 = vadd.xlane.f32.xlu0 %v6360_v17 }
 0xe6c   :  { %v8495_v30 = vsub.f32 %v6331_v59, %v6363_v20  ;;  %v6366_v34 = vmul.f32 0.03125, %v6350_v10  ;;  %v6357_v40 = vsel %vm100_vm1, %v6337_v16, 0.0  ;;  %v6380_v33 = vmul.f32 %v8492_v19, %v8492_v19 }
 0xe6d   :  { %6358 = vadd.xlane.f32.xlu1 %v6357_v40  ;;  %v6347_v62 = vpop.xlane.xlu1 %6346 }
 0xe6e   :  { %v6374_v25 = vsub.f32 %v6334_v21, %v6366_v34  ;;  %v6365_v23 = vmul.f32 0.03125, %v6347_v62  ;;  %v6390_v6 = vsel %vm100_vm1, %v6380_v33, 0.0  ;;  %v6379_v26 = vmul.f32 %v8495_v30, %v8495_v30 }
 0xe6f   :  { %6391 = vadd.xlane.f32.xlu0 %v6390_v6 }
 0xe70   :  { %v6373_v39 = vsub.f32 %v6333_v51, %v6365_v23  ;;  %v6387_v36 = vsel %vm100_vm1, %v6379_v26, 0.0  ;;  %v6382_v35 = vmul.f32 %v6374_v25, %v6374_v25 }
 0xe71   :  { %6388 = vadd.xlane.f32.xlu1 %v6387_v36 }
 0xe72   :  { %v6396_v42 = vsel %vm100_vm1, %v6382_v35, 0.0  ;;  %v6381_v14 = vmul.f32 %v6373_v39, %v6373_v39 }
 0xe73   :  { %6397 = vadd.xlane.f32.xlu0 %v6396_v42 }
 0xe74   :  { %v6393_v18 = vsel %vm100_vm1, %v6381_v14, 0.0 }
 0xe75   :  { %6394 = vadd.xlane.f32.xlu1 %v6393_v18 }
 0xef0   :  { %v6356_v47 = vpop.xlane.xlu0 %6355 }
 0xef1   :  { %v6368_v44 = vmul.f32 0.03125, %v6356_v47 }
 0xef2   :  { %v6353_v38 = vpop.xlane.xlu1 %6352 }
 0xef3   :  { %v8506_v5 = vsub.f32 %v6336_v45, %v6368_v44  ;;  %v6367_v50 = vmul.f32 0.03125, %v6353_v38 }
 0xef4   :  { %v6362_v56 = vpop.xlane.xlu0 %6361 }
 0xef5   :  { %v8508_v52 = vsub.f32 %v6335_v8, %v6367_v50  ;;  %v6370_v46 = vmul.f32 0.03125, %v6362_v56  ;;  %v6384_v58 = vmul.f32 %v8506_v5, %v8506_v5 }
 0xef6   :  { %v6359_v28 = vpop.xlane.xlu1 %6358 }
 0xef7   :  { %v8512_v3 = vsub.f32 %v6338_v1, %v6370_v46  ;;  %v6369_v13 = vmul.f32 0.03125, %v6359_v28  ;;  %v6402_v59 = vsel %vm100_vm1, %v6384_v58, 0.0  ;;  %v6383_v53 = vmul.f32 %v8508_v52, %v8508_v52 }
 0xef8   :  { %6403 = vadd.xlane.f32.xlu0 %v6402_v59  ;;  %v6392_v29 = vpop.xlane.xlu0 %6391 }
 0xef9   :  { %v8517_v37 = vsub.f32 %v6337_v16, %v6369_v13  ;;  %v6412_v21 = vmul.f32 0.03125, %v6392_v29  ;;  %v6399_v60 = vsel %vm100_vm1, %v6383_v53, 0.0  ;;  %v6386_v57 = vmul.f32 %v8512_v3, %v8512_v3 }
 0xefa   :  { %6400 = vadd.xlane.f32.xlu1 %v6399_v60  ;;  %v6389_v51 = vpop.xlane.xlu1 %6388 }
 0xefb   :  { %v6420_v54 = vadd.f32 1e-05, %v6412_v21  ;;  %v6411_v0 = vmul.f32 0.03125, %v6389_v51  ;;  %v6408_v63 = vsel %vm100_vm1, %v6386_v57, 0.0  ;;  %v6385_v55 = vmul.f32 %v8517_v37, %v8517_v37 }
 0xefc   :  { %6409 = vadd.xlane.f32.xlu0 %v6408_v63  ;;  %v6398_v2 = vpop.xlane.xlu0 %6397 }
 0xefd   :  { %7405 = vrsqrt.f32 %v6420_v54  ;;  %v6419_v43 = vadd.f32 1e-05, %v6411_v0  ;;  %v6414_v4 = vmul.f32 0.03125, %v6398_v2  ;;  %v6405_v41 = vsel %vm100_vm1, %v6385_v55, 0.0 }
 0xefe   :  { %6406 = vadd.xlane.f32.xlu1 %v6405_v41  ;;  %v6395_v45 = vpop.xlane.xlu1 %6394 }
 0xeff   :  { %7407 = vrsqrt.f32 %v6419_v43  ;;  %v6422_v48 = vadd.f32 1e-05, %v6414_v4  ;;  %v6413_v11 = vmul.f32 0.03125, %v6395_v45 }
 0xf01   :  { %7409 = vrsqrt.f32 %v6422_v48  ;;  %v6421_v27 = vadd.f32 1e-05, %v6413_v11 }
 0xf03   :  { %7411 = vrsqrt.f32 %v6421_v27 }
 0xf0a   :  { %v7406_v8 = vpop.eup %7405 }
 0xf0b   :  { %v6436_v61 = vmul.f32 %v7406_v8, %v8492_v19 }
 0xf0c   :  { %v7408_v24 = vpop.eup %7407 }
 0xf0d   :  { %v6448_v22 = vmul.f32 %v7625_v31, %v6436_v61  ;;  %v6435_v49 = vmul.f32 %v7408_v24, %v8495_v30 }
 0xf0e   :  { %v7410_v1 = vpop.eup %7409 }
 0xf0f   :  { %v6460_v7 = vadd.f32 %v7627_v32, %v6448_v22  ;;  %v6447_v12 = vmul.f32 %v7625_v31, %v6435_v49  ;;  %v6438_v15 = vmul.f32 %v7410_v1, %v6374_v25 }
 0xf10   :  { %v7412_v9 = vpop.eup %7411 }
 0xf11   :  { %6468 = vst.msk [vmem:[%s8588_s8 + $0x8] sm:$0xff] %vm100_vm1, %v6460_v7  ;;  %v6459_v16 = vadd.f32 %v7627_v32, %v6447_v12  ;;  %v6450_v19 = vmul.f32 %v7625_v31, %v6438_v15  ;;  %v6437_v20 = vmul.f32 %v7412_v9, %v6373_v39 }
 0xf13   :  { %6467 = vst.msk [vmem:[%s8588_s8] sm:$0xff] %vm100_vm1, %v6459_v16  ;;  %v6462_v17 = vadd.f32 %v7627_v32, %v6450_v19  ;;  %v6449_v10 = vmul.f32 %v7625_v31, %v6437_v20 }
 0xf15   :  { %6470 = vst.msk [vmem:[%s8588_s8 + $0x18] sm:$0xff] %vm100_vm1, %v6462_v17  ;;  %v6461_v30 = vadd.f32 %v7627_v32, %v6449_v10 }
 0xf17   :  { %6469 = vst.msk [vmem:[%s8588_s8 + $0x10] sm:$0xff] %vm100_vm1, %v6461_v30 }
 0xf81   :  { %v6404_v34 = vpop.xlane.xlu0 %6403 }
 0xf82   :  { %v6416_v40 = vmul.f32 0.03125, %v6404_v34 }
 0xf83   :  { %v6401_v33 = vpop.xlane.xlu1 %6400 }
 0xf84   :  { %v6424_v62 = vadd.f32 1e-05, %v6416_v40  ;;  %v6415_v25 = vmul.f32 0.03125, %v6401_v33 }
 0xf85   :  { %v6410_v23 = vpop.xlane.xlu0 %6409 }
 0xf86   :  { %7413 = vrsqrt.f32 %v6424_v62  ;;  %v6423_v6 = vadd.f32 1e-05, %v6415_v25  ;;  %v6418_v26 = vmul.f32 0.03125, %v6410_v23 }
 0xf87   :  { %v6407_v39 = vpop.xlane.xlu1 %6406 }
 0xf88   :  { %7415 = vrsqrt.f32 %v6423_v6  ;;  %v6426_v36 = vadd.f32 1e-05, %v6418_v26  ;;  %v6417_v35 = vmul.f32 0.03125, %v6407_v39 }
 0xf8a   :  { %7417 = vrsqrt.f32 %v6426_v36  ;;  %v6425_v42 = vadd.f32 1e-05, %v6417_v35 }
 0xf8c   :  { %7419 = vrsqrt.f32 %v6425_v42 }
 0xf93   :  { %v7414_v14 = vpop.eup %7413 }
 0xf94   :  { %v6440_v18 = vmul.f32 %v7414_v14, %v8506_v5 }
 0xf95   :  { %v7416_v47 = vpop.eup %7415 }
 0xf96   :  { %v6452_v44 = vmul.f32 %v7625_v31, %v6440_v18  ;;  %v6439_v38 = vmul.f32 %v7416_v47, %v8508_v52 }
 0xf97   :  { %v7418_v50 = vpop.eup %7417 }
 0xf98   :  { %v6464_v56 = vadd.f32 %v7627_v32, %v6452_v44  ;;  %v6451_v46 = vmul.f32 %v7625_v31, %v6439_v38  ;;  %v6442_v58 = vmul.f32 %v7418_v50, %v8512_v3 }
 0xf99   :  { %v7420_v28 = vpop.eup %7419 }
 0xf9a   :  { %6472 = vst.msk [vmem:[%s8588_s8 + $0x28] sm:$0xff] %vm100_vm1, %v6464_v56  ;;  %v6463_v5 = vadd.f32 %v7627_v32, %v6451_v46  ;;  %v6454_v13 = vmul.f32 %v7625_v31, %v6442_v58  ;;  %v6441_v59 = vmul.f32 %v7420_v28, %v8517_v37 }
 0xf9c   :  { %6471 = vst.msk [vmem:[%s8588_s8 + $0x20] sm:$0xff] %vm100_vm1, %v6463_v5  ;;  %v6466_v52 = vadd.f32 %v7627_v32, %v6454_v13  ;;  %v6453_v3 = vmul.f32 %v7625_v31, %v6441_v59 }
 0xf9e   :  { %6474 = vst.msk [vmem:[%s8588_s8 + $0x38] sm:$0xff] %vm100_vm1, %v6466_v52  ;;  %v6465_v53 = vadd.f32 %v7627_v32, %v6453_v3 }
 0xfa0   :  { %6473 = vst.msk [vmem:[%s8588_s8 + $0x30] sm:$0xff] %vm100_vm1, %v6465_v53 }
 0xfa1   :  { %6479 = vsyncpa [#allocation3], 1 }
 0xfa2   :  { %6480 = vsyncpa [#allocation5], 1 }

</bundles_post_ra>
